<compile_context>
chip_gen: v6e
topology: v6e:2x2x1
jax: 0.10.0
libtpu: 0.0.40
codegen_flags: <defaults>
</compile_context>

<pallas_src>
import functools

import jax
import jax.numpy as jnp
import numpy as np
from jax.experimental import pallas as pl
from jax.experimental.pallas import tpu as pltpu

LAMBDA_STATE = 0.1
LAMBDA_LATENT = 0.2
LAMBDA_REG = 0.5

_HIGHEST = jax.lax.Precision.HIGHEST


def _mm(a, b):
    return jnp.dot(a, b, precision=_HIGHEST, preferred_element_type=jnp.float32)


def _multistep_loss_kernel(x_ref, acts_ref,
                           wenc_ref, benc_ref, wdec_ref, bdec_ref,
                           wdd_ref, bdd_ref, muu_ref, xic_ref, xiz_ref, xia_ref,
                           out_ref,
                           us_ref, zs_ref,
                           *, tb, t_steps):
    TB, T = tb, t_steps
    x = x_ref[...]            # (Tp1*TB, D) frames; rows are time-major within the block
    acts = acts_ref[...]      # (T*TB, A)   actions; same row ordering
    wenc = wenc_ref[...]      # (D, Z)
    benc = benc_ref[...]      # (1, Z)
    wdec = wdec_ref[...]      # (Z, D)
    bdec = bdec_ref[...]      # (1, D)
    wdd = wdd_ref[...]        # (Z, Z) = W_dec @ W_enc      (collapsed dec->enc)
    bdd = bdd_ref[...]        # (1, Z) = b_dec @ W_enc + b_enc
    muu = muu_ref[...]        # (Z, Z) = xi_z @ wdd         (collapsed state-rollout step)
    xic = xic_ref[...]        # (1, Z)  masked Xi, constant-library row
    xiz = xiz_ref[...]        # (Z, Z)  masked Xi, z rows
    xia = xia_ref[...]        # (A, Z)  masked Xi, action rows

    # ---- encode every frame of every trajectory in one fat matmul ------------
    lat = _mm(x, wenc) + benc                 # (Tp1*TB, Z)
    z0 = lat[0:TB, :]                         # frame-0 latents (rollout start)
    lat_rest = lat[TB:, :]                    # latent targets for frames 1..T
    x_rest = x[TB:, :]                        # state targets for frames 1..T

    # ---- action-library / additive terms hoisted out of the rollout loop -----
    d = _mm(acts, xia) + xic                  # (T*TB, Z)  d_t = sindy drive
    e = _mm(d, wdd) + bdd                     # (T*TB, Z)  state-chain additive term

    # ---- multi-step rollout: two tiny dependent dots per step, TB rows each --
    z = z0                                    # latent-space rollout carry
    u = z0                                    # encode(prev_state) carry (collapsed)
    for t in range(T):                        # T small & static -> unrolled
        lo = t * TB
        us_ref[pl.ds(lo, TB), :] = u          # u_t needed later for v_t
        z = _mm(z, xiz) + d[lo:lo + TB, :]     # z_{t+1}
        zs_ref[pl.ds(lo, TB), :] = z
        u = _mm(u, muu) + e[lo:lo + TB, :]     # u_{t+1} = encode(decode(v_t))

    # pre-decode latents of all predicted states, one batched matmul
    v = _mm(us_ref[...], xiz) + d             # (T*TB, Z)

    # ---- fused decode: reconstruction + prediction in a single matmul --------
    dec_in = jnp.concatenate([lat, v], axis=0)            # ((Tp1+T)*TB, Z)
    dec = _mm(dec_in, wdec) + bdec                         # ((Tp1+T)*TB, D)
    rec = dec[0:lat.shape[0], :]
    pred = dec[lat.shape[0]:, :]

    rec_sq = jnp.sum((rec - x) ** 2)
    pred_sq = jnp.sum((pred - x_rest) ** 2)
    lat_sq = jnp.sum((zs_ref[...] - lat_rest) ** 2)

    # ---- emit lane-dense per-block partial sums -------------------------------
    lanes = jax.lax.broadcasted_iota(jnp.int32, (1, out_ref.shape[-1]), 1)
    out_ref[...] = jnp.where(lanes == 0, rec_sq,
                   jnp.where(lanes == 1, pred_sq,
                   jnp.where(lanes == 2, lat_sq, 0.0)))


def _pick_tb(b):
    """Largest divisor of b that is <= 32 (trajectories per grid step)."""
    for cand in range(min(b, 32), 0, -1):
        if b % cand == 0:
            return cand
    return 1


@jax.jit
def multi_step_loss(states_img, actions, wenc, benc, wdec, bdec, xi, mask):
    B, Tp1, C, H, W = states_img.shape
    D = C * H * W
    T = Tp1 - 1
    Z = wenc.shape[1]
    A = actions.shape[2]
    NL = 128                      # lane-dense partial-sum row width

    TB = _pick_tb(B)              # trajectories per grid step
    G = B // TB                   # grid length

    f32 = jnp.float32
    # Layout plumbing done once in XLA (outside the kernel): flatten NCHW frames
    # and make rows time-major within each trajectory block so the kernel never
    # reshapes across a non-8-aligned sublane dim.
    x = states_img.reshape(B, Tp1, D).astype(f32)
    x = x.reshape(G, TB, Tp1, D).transpose(0, 2, 1, 3).reshape(G, Tp1 * TB, D)
    a = actions.astype(f32)
    a = a.reshape(G, TB, T, A).transpose(0, 2, 1, 3).reshape(G, T * TB, A)

    wenc = wenc.astype(f32)
    benc = benc.astype(f32)
    wdec = wdec.astype(f32)
    bdec = bdec.astype(f32)
    xi_m = (xi * mask).astype(f32)
    xi_c = xi_m[0:1, :]                       # [1 | z | a] library split
    xi_z = xi_m[1:1 + Z, :]
    xi_a = xi_m[1 + Z:1 + Z + A, :]
    # Collapsed operators (precision pinned so reuse without global config is safe):
    w_dd = jnp.dot(wdec, wenc, precision=_HIGHEST)            # (Z, Z) decode->encode
    b_dd = jnp.dot(bdec, wenc, precision=_HIGHEST) + benc     # (1, Z)
    m_uu = jnp.dot(xi_z, w_dd, precision=_HIGHEST)            # (Z, Z) one-step state rollout

    args = (x, a, wenc, benc, wdec, bdec, w_dd, b_dd, m_uu, xi_c, xi_z, xi_a)

    def const_spec(arr):
        nd = arr.ndim
        return pl.BlockSpec(arr.shape, lambda g, _nd=nd: (0,) * _nd)

    in_specs = [
        pl.BlockSpec((None, Tp1 * TB, D), lambda g: (g, 0, 0)),   # states (per block)
        pl.BlockSpec((None, T * TB, A), lambda g: (g, 0, 0)),     # actions (per block)
    ] + [const_spec(arr) for arr in args[2:]]                     # weights, fetched once

    flops = 2 * B * (Tp1 * D * Z            # encode
                     + (Tp1 + T) * Z * D    # fused decode (rec + pred)
                     + T * A * Z            # drives
                     + 4 * T * Z * Z)       # e + rollout (z,u) + v
    bytes_accessed = 4 * (x.size + a.size
                          + sum(int(arr.size) for arr in args[2:]) + G * NL)

    kern = functools.partial(_multistep_loss_kernel, tb=TB, t_steps=T)
    partials = pl.pallas_call(
        kern,
        out_shape=jax.ShapeDtypeStruct((G, 1, NL), f32),
        grid_spec=pltpu.PrefetchScalarGridSpec(
            num_scalar_prefetch=0,
            grid=(G,),
            in_specs=in_specs,
            out_specs=pl.BlockSpec((None, 1, NL), lambda g: (g, 0, 0)),
            scratch_shapes=[pltpu.VMEM((T * TB, Z), f32),   # u_t rows
                            pltpu.VMEM((T * TB, Z), f32)],  # z_{t+1} rows
        ),
        compiler_params=pltpu.CompilerParams(
            # Only shard the grid across TensorCores when each core gets several
            # steps; at a 1-step grid run on a single core.
            dimension_semantics=("parallel",) if G >= 8 else ("arbitrary",),
            vmem_limit_bytes=32 * 1024 * 1024,
        ),
        cost_estimate=pl.CostEstimate(flops=flops, transcendentals=0,
                                      bytes_accessed=bytes_accessed),
    )(*args)

    rec_loss = jnp.sum(partials[:, 0, 0]) / (B * Tp1 * D)
    pred_loss = jnp.sum(partials[:, 0, 1]) / (B * T * D)
    lat_loss = jnp.sum(partials[:, 0, 2]) / (B * T * Z)
    reg_loss = jnp.mean(jnp.abs(xi))          # reg uses the UNMASKED coefficients
    return (rec_loss + LAMBDA_STATE * pred_loss
            + LAMBDA_LATENT * lat_loss + LAMBDA_REG * reg_loss)


def reference_loss(states_img, actions, wenc, benc, wdec, bdec, xi, mask):
    """Pure-JAX mirror of the PyTorch MultiStepLoss.forward semantics."""
    B, Tp1, C, H, W = states_img.shape
    D = C * H * W
    T = Tp1 - 1
    Z = wenc.shape[1]
    x = states_img.reshape(B, Tp1, D).astype(jnp.float32)

    encode = lambda s: s @ wenc + benc
    decode = lambda z: z @ wdec + bdec

    def sindy(z, a):
        theta = jnp.concatenate([jnp.ones((z.shape[0], 1), jnp.float32), z, a], -1)
        return theta @ (xi * mask)

    latent = encode(x.reshape(B * Tp1, D)).reshape(B, Tp1, Z)
    rec = jnp.mean((decode(latent.reshape(B * Tp1, Z)) - x.reshape(B * Tp1, D)) ** 2)

    prev_z, prev_s = latent[:, 0], x[:, 0]
    pred_s, pred_z = [], []
    for t in range(T):
        a = actions[:, t]
        nz = sindy(prev_z, a)
        ns = decode(sindy(encode(prev_s), a))
        pred_s.append(ns)
        pred_z.append(nz)
        prev_z, prev_s = nz, ns
    ps = jnp.stack(pred_s, 1)
    pz = jnp.stack(pred_z, 1)
    pred_loss = jnp.mean((ps - x[:, 1:]) ** 2)
    lat_loss = jnp.mean((pz - latent[:, 1:]) ** 2)
    reg = jnp.mean(jnp.abs(xi))
    return rec + LAMBDA_STATE * pred_loss + LAMBDA_LATENT * lat_loss + LAMBDA_REG * reg


if __name__ == "__main__":
    jax.config.update("jax_default_matmul_precision", "highest")

    B, T, C, H, W = 2, 4, 1, 16, 16
    D = C * H * W
    Z, A = 8, 4
    L = 1 + Z + A

    key = jax.random.PRNGKey(0)
    ks = jax.random.split(key, 8)
    states = jax.random.normal(ks[0], (B, T + 1, C, H, W), jnp.float32)
    actions = jax.random.normal(ks[1], (B, T, A), jnp.float32)
    wenc = jax.random.normal(ks[2], (D, Z), jnp.float32) * 0.05
    benc = jax.random.normal(ks[3], (1, Z), jnp.float32) * 0.01
    wdec = jax.random.normal(ks[4], (Z, D), jnp.float32) * 0.05
    bdec = jax.random.normal(ks[5], (1, D), jnp.float32) * 0.01
    xi = jax.random.normal(ks[6], (L, Z), jnp.float32) * 0.1
    mask = (jax.random.uniform(ks[7], (L, Z)) > 0.3).astype(jnp.float32)

    loss = multi_step_loss(states, actions, wenc, benc, wdec, bdec, xi, mask)
    loss = jax.block_until_ready(loss)

    ref = reference_loss(states, actions, wenc, benc, wdec, bdec, xi, mask)
    np.testing.assert_allclose(float(loss), float(ref), rtol=5e-3, atol=1e-4)

    print("KERNEL_OK")
</pallas_src>

<mosaic_0001>
module attributes {stable_mosaic.version = 11 : i64} {
  func.func @_multistep_loss_kernel(%arg0: i32, %arg1: memref<1x10x256xf32, #tpu.memory_space<vmem>>, %arg2: memref<1x8x4xf32, #tpu.memory_space<vmem>>, %arg3: memref<256x8xf32, #tpu.memory_space<vmem>>, %arg4: memref<1x8xf32, #tpu.memory_space<vmem>>, %arg5: memref<8x256xf32, #tpu.memory_space<vmem>>, %arg6: memref<1x256xf32, #tpu.memory_space<vmem>>, %arg7: memref<8x8xf32, #tpu.memory_space<vmem>>, %arg8: memref<1x8xf32, #tpu.memory_space<vmem>>, %arg9: memref<8x8xf32, #tpu.memory_space<vmem>>, %arg10: memref<1x8xf32, #tpu.memory_space<vmem>>, %arg11: memref<8x8xf32, #tpu.memory_space<vmem>>, %arg12: memref<4x8xf32, #tpu.memory_space<vmem>>, %arg13: memref<1x1x128xf32, #tpu.memory_space<vmem>>, %arg14: memref<8x8xf32, #tpu.memory_space<vmem>>, %arg15: memref<8x8xf32, #tpu.memory_space<vmem>>) attributes {dimension_semantics = [#tpu.dimension_semantics<arbitrary>], iteration_bounds = array<i64: 1>, scalar_prefetch = 0 : i64, scratch_operands = 2 : i64, tpu.core_type = #tpu.core_type<tc>, window_params = [{transform_indices = @transform_0, window_bounds = array<i64: 1, 10, 256>}, {transform_indices = @transform_1, window_bounds = array<i64: 1, 8, 4>}, {pipeline_mode = #tpu.pipeline_mode<synchronous>, transform_indices = @transform_2, window_bounds = array<i64: 256, 8>}, {pipeline_mode = #tpu.pipeline_mode<synchronous>, transform_indices = @transform_3, window_bounds = array<i64: 1, 8>}, {pipeline_mode = #tpu.pipeline_mode<synchronous>, transform_indices = @transform_4, window_bounds = array<i64: 8, 256>}, {pipeline_mode = #tpu.pipeline_mode<synchronous>, transform_indices = @transform_5, window_bounds = array<i64: 1, 256>}, {pipeline_mode = #tpu.pipeline_mode<synchronous>, transform_indices = @transform_6, window_bounds = array<i64: 8, 8>}, {pipeline_mode = #tpu.pipeline_mode<synchronous>, transform_indices = @transform_7, window_bounds = array<i64: 1, 8>}, {pipeline_mode = #tpu.pipeline_mode<synchronous>, transform_indices = @transform_8, window_bounds = array<i64: 8, 8>}, {pipeline_mode = #tpu.pipeline_mode<synchronous>, transform_indices = @transform_9, window_bounds = array<i64: 1, 8>}, {pipeline_mode = #tpu.pipeline_mode<synchronous>, transform_indices = @transform_10, window_bounds = array<i64: 8, 8>}, {pipeline_mode = #tpu.pipeline_mode<synchronous>, transform_indices = @transform_11, window_bounds = array<i64: 4, 8>}, {transform_indices = @transform_12, window_bounds = array<i64: 1, 1, 128>}]} {
    %c0 = arith.constant 0 : index
    %c0_0 = arith.constant 0 : index
    %c0_1 = arith.constant 0 : index
    %0 = vector.load %arg1[%c0, %c0_0, %c0_1] : memref<1x10x256xf32, #tpu.memory_space<vmem>>, vector<1x10x256xf32>
    %1 = vector.shape_cast %0 : vector<1x10x256xf32> to vector<10x256xf32>
    %c0_2 = arith.constant 0 : index
    %c0_3 = arith.constant 0 : index
    %c0_4 = arith.constant 0 : index
    %2 = vector.load %arg2[%c0_2, %c0_3, %c0_4] : memref<1x8x4xf32, #tpu.memory_space<vmem>>, vector<1x8x4xf32>
    %3 = vector.shape_cast %2 : vector<1x8x4xf32> to vector<8x4xf32>
    %c0_5 = arith.constant 0 : index
    %c0_6 = arith.constant 0 : index
    %4 = vector.load %arg3[%c0_5, %c0_6] : memref<256x8xf32, #tpu.memory_space<vmem>>, vector<256x8xf32>
    %c0_7 = arith.constant 0 : index
    %c0_8 = arith.constant 0 : index
    %5 = vector.load %arg4[%c0_7, %c0_8] : memref<1x8xf32, #tpu.memory_space<vmem>>, vector<1x8xf32>
    %c0_9 = arith.constant 0 : index
    %c0_10 = arith.constant 0 : index
    %6 = vector.load %arg5[%c0_9, %c0_10] : memref<8x256xf32, #tpu.memory_space<vmem>>, vector<8x256xf32>
    %c0_11 = arith.constant 0 : index
    %c0_12 = arith.constant 0 : index
    %7 = vector.load %arg6[%c0_11, %c0_12] : memref<1x256xf32, #tpu.memory_space<vmem>>, vector<1x256xf32>
    %c0_13 = arith.constant 0 : index
    %c0_14 = arith.constant 0 : index
    %8 = vector.load %arg7[%c0_13, %c0_14] : memref<8x8xf32, #tpu.memory_space<vmem>>, vector<8x8xf32>
    %c0_15 = arith.constant 0 : index
    %c0_16 = arith.constant 0 : index
    %9 = vector.load %arg8[%c0_15, %c0_16] : memref<1x8xf32, #tpu.memory_space<vmem>>, vector<1x8xf32>
    %c0_17 = arith.constant 0 : index
    %c0_18 = arith.constant 0 : index
    %10 = vector.load %arg9[%c0_17, %c0_18] : memref<8x8xf32, #tpu.memory_space<vmem>>, vector<8x8xf32>
    %c0_19 = arith.constant 0 : index
    %c0_20 = arith.constant 0 : index
    %11 = vector.load %arg10[%c0_19, %c0_20] : memref<1x8xf32, #tpu.memory_space<vmem>>, vector<1x8xf32>
    %c0_21 = arith.constant 0 : index
    %c0_22 = arith.constant 0 : index
    %12 = vector.load %arg11[%c0_21, %c0_22] : memref<8x8xf32, #tpu.memory_space<vmem>>, vector<8x8xf32>
    %c0_23 = arith.constant 0 : index
    %c0_24 = arith.constant 0 : index
    %13 = vector.load %arg12[%c0_23, %c0_24] : memref<4x8xf32, #tpu.memory_space<vmem>>, vector<4x8xf32>
    %cst = arith.constant dense<0.000000e+00> : vector<10x8xf32>
    %14 = tpu.matmul %1, %4, %cst {dimension_numbers = #tpu.dot_dimension_numbers<[1], [0], [0], [1], [0, 0, 1, 1], [], []>, precision = #tpu.contract_precision<fp32>} : vector<10x256xf32>, vector<256x8xf32>, vector<10x8xf32> -> vector<10x8xf32>
    %15 = vector.broadcast %5 : vector<1x8xf32> to vector<10x8xf32>
    %16 = arith.addf %14, %15 : vector<10x8xf32>
    %17 = vector.extract_strided_slice %16 {offsets = [0, 0], sizes = [2, 8], strides = [1, 1]} : vector<10x8xf32> to vector<2x8xf32>
    %18 = vector.extract_strided_slice %16 {offsets = [2, 0], sizes = [8, 8], strides = [1, 1]} : vector<10x8xf32> to vector<8x8xf32>
    %19 = vector.extract_strided_slice %1 {offsets = [2, 0], sizes = [8, 256], strides = [1, 1]} : vector<10x256xf32> to vector<8x256xf32>
    %cst_25 = arith.constant dense<0.000000e+00> : vector<8x8xf32>
    %20 = tpu.matmul %3, %13, %cst_25 {dimension_numbers = #tpu.dot_dimension_numbers<[1], [0], [0], [1], [0, 0, 1, 1], [], []>, precision = #tpu.contract_precision<fp32>} : vector<8x4xf32>, vector<4x8xf32>, vector<8x8xf32> -> vector<8x8xf32>
    %21 = vector.broadcast %11 : vector<1x8xf32> to vector<8x8xf32>
    %22 = arith.addf %20, %21 : vector<8x8xf32>
    %cst_26 = arith.constant dense<0.000000e+00> : vector<8x8xf32>
    %23 = tpu.matmul %22, %8, %cst_26 {dimension_numbers = #tpu.dot_dimension_numbers<[1], [0], [0], [1], [0, 0, 1, 1], [], []>, precision = #tpu.contract_precision<fp32>} : vector<8x8xf32>, vector<8x8xf32>, vector<8x8xf32> -> vector<8x8xf32>
    %24 = vector.broadcast %9 : vector<1x8xf32> to vector<8x8xf32>
    %25 = arith.addf %23, %24 : vector<8x8xf32>
    %c0_27 = arith.constant 0 : index
    %c0_28 = arith.constant 0 : index
    %26 = vector.load %arg14[%c0_27, %c0_28] : memref<8x8xf32, #tpu.memory_space<vmem>>, vector<2x8xf32>
    tpu.vector_store %arg14[%c0_27, %c0_28], %17 {strides = array<i32>} : memref<8x8xf32, #tpu.memory_space<vmem>>, vector<2x8xf32>,
    %cst_29 = arith.constant dense<0.000000e+00> : vector<2x8xf32>
    %27 = tpu.matmul %17, %12, %cst_29 {dimension_numbers = #tpu.dot_dimension_numbers<[1], [0], [0], [1], [0, 0, 1, 1], [], []>, precision = #tpu.contract_precision<fp32>} : vector<2x8xf32>, vector<8x8xf32>, vector<2x8xf32> -> vector<2x8xf32>
    %28 = vector.extract_strided_slice %22 {offsets = [0, 0], sizes = [2, 8], strides = [1, 1]} : vector<8x8xf32> to vector<2x8xf32>
    %29 = arith.addf %27, %28 : vector<2x8xf32>
    %c0_30 = arith.constant 0 : index
    %c0_31 = arith.constant 0 : index
    %30 = vector.load %arg15[%c0_30, %c0_31] : memref<8x8xf32, #tpu.memory_space<vmem>>, vector<2x8xf32>
    tpu.vector_store %arg15[%c0_30, %c0_31], %29 {strides = array<i32>} : memref<8x8xf32, #tpu.memory_space<vmem>>, vector<2x8xf32>,
    %cst_32 = arith.constant dense<0.000000e+00> : vector<2x8xf32>
    %31 = tpu.matmul %17, %10, %cst_32 {dimension_numbers = #tpu.dot_dimension_numbers<[1], [0], [0], [1], [0, 0, 1, 1], [], []>, precision = #tpu.contract_precision<fp32>} : vector<2x8xf32>, vector<8x8xf32>, vector<2x8xf32> -> vector<2x8xf32>
    %32 = vector.extract_strided_slice %25 {offsets = [0, 0], sizes = [2, 8], strides = [1, 1]} : vector<8x8xf32> to vector<2x8xf32>
    %33 = arith.addf %31, %32 : vector<2x8xf32>
    %c2 = arith.constant 2 : index
    %c0_33 = arith.constant 0 : index
    %34 = vector.load %arg14[%c2, %c0_33] : memref<8x8xf32, #tpu.memory_space<vmem>>, vector<2x8xf32>
    tpu.vector_store %arg14[%c2, %c0_33], %33 {strides = array<i32>} : memref<8x8xf32, #tpu.memory_space<vmem>>, vector<2x8xf32>,
    %cst_34 = arith.constant dense<0.000000e+00> : vector<2x8xf32>
    %35 = tpu.matmul %29, %12, %cst_34 {dimension_numbers = #tpu.dot_dimension_numbers<[1], [0], [0], [1], [0, 0, 1, 1], [], []>, precision = #tpu.contract_precision<fp32>} : vector<2x8xf32>, vector<8x8xf32>, vector<2x8xf32> -> vector<2x8xf32>
    %36 = vector.extract_strided_slice %22 {offsets = [2, 0], sizes = [2, 8], strides = [1, 1]} : vector<8x8xf32> to vector<2x8xf32>
    %37 = arith.addf %35, %36 : vector<2x8xf32>
    %c2_35 = arith.constant 2 : index
    %c0_36 = arith.constant 0 : index
    %38 = vector.load %arg15[%c2_35, %c0_36] : memref<8x8xf32, #tpu.memory_space<vmem>>, vector<2x8xf32>
    tpu.vector_store %arg15[%c2_35, %c0_36], %37 {strides = array<i32>} : memref<8x8xf32, #tpu.memory_space<vmem>>, vector<2x8xf32>,
    %cst_37 = arith.constant dense<0.000000e+00> : vector<2x8xf32>
    %39 = tpu.matmul %33, %10, %cst_37 {dimension_numbers = #tpu.dot_dimension_numbers<[1], [0], [0], [1], [0, 0, 1, 1], [], []>, precision = #tpu.contract_precision<fp32>} : vector<2x8xf32>, vector<8x8xf32>, vector<2x8xf32> -> vector<2x8xf32>
    %40 = vector.extract_strided_slice %25 {offsets = [2, 0], sizes = [2, 8], strides = [1, 1]} : vector<8x8xf32> to vector<2x8xf32>
    %41 = arith.addf %39, %40 : vector<2x8xf32>
    %c4 = arith.constant 4 : index
    %c0_38 = arith.constant 0 : index
    %42 = vector.load %arg14[%c4, %c0_38] : memref<8x8xf32, #tpu.memory_space<vmem>>, vector<2x8xf32>
    tpu.vector_store %arg14[%c4, %c0_38], %41 {strides = array<i32>} : memref<8x8xf32, #tpu.memory_space<vmem>>, vector<2x8xf32>,
    %cst_39 = arith.constant dense<0.000000e+00> : vector<2x8xf32>
    %43 = tpu.matmul %37, %12, %cst_39 {dimension_numbers = #tpu.dot_dimension_numbers<[1], [0], [0], [1], [0, 0, 1, 1], [], []>, precision = #tpu.contract_precision<fp32>} : vector<2x8xf32>, vector<8x8xf32>, vector<2x8xf32> -> vector<2x8xf32>
    %44 = vector.extract_strided_slice %22 {offsets = [4, 0], sizes = [2, 8], strides = [1, 1]} : vector<8x8xf32> to vector<2x8xf32>
    %45 = arith.addf %43, %44 : vector<2x8xf32>
    %c4_40 = arith.constant 4 : index
    %c0_41 = arith.constant 0 : index
    %46 = vector.load %arg15[%c4_40, %c0_41] : memref<8x8xf32, #tpu.memory_space<vmem>>, vector<2x8xf32>
    tpu.vector_store %arg15[%c4_40, %c0_41], %45 {strides = array<i32>} : memref<8x8xf32, #tpu.memory_space<vmem>>, vector<2x8xf32>,
    %cst_42 = arith.constant dense<0.000000e+00> : vector<2x8xf32>
    %47 = tpu.matmul %41, %10, %cst_42 {dimension_numbers = #tpu.dot_dimension_numbers<[1], [0], [0], [1], [0, 0, 1, 1], [], []>, precision = #tpu.contract_precision<fp32>} : vector<2x8xf32>, vector<8x8xf32>, vector<2x8xf32> -> vector<2x8xf32>
    %48 = vector.extract_strided_slice %25 {offsets = [4, 0], sizes = [2, 8], strides = [1, 1]} : vector<8x8xf32> to vector<2x8xf32>
    %49 = arith.addf %47, %48 : vector<2x8xf32>
    %c6 = arith.constant 6 : index
    %c0_43 = arith.constant 0 : index
    %50 = vector.load %arg14[%c6, %c0_43] : memref<8x8xf32, #tpu.memory_space<vmem>>, vector<2x8xf32>
    tpu.vector_store %arg14[%c6, %c0_43], %49 {strides = array<i32>} : memref<8x8xf32, #tpu.memory_space<vmem>>, vector<2x8xf32>,
    %cst_44 = arith.constant dense<0.000000e+00> : vector<2x8xf32>
    %51 = tpu.matmul %45, %12, %cst_44 {dimension_numbers = #tpu.dot_dimension_numbers<[1], [0], [0], [1], [0, 0, 1, 1], [], []>, precision = #tpu.contract_precision<fp32>} : vector<2x8xf32>, vector<8x8xf32>, vector<2x8xf32> -> vector<2x8xf32>
    %52 = vector.extract_strided_slice %22 {offsets = [6, 0], sizes = [2, 8], strides = [1, 1]} : vector<8x8xf32> to vector<2x8xf32>
    %53 = arith.addf %51, %52 : vector<2x8xf32>
    %c6_45 = arith.constant 6 : index
    %c0_46 = arith.constant 0 : index
    %54 = vector.load %arg15[%c6_45, %c0_46] : memref<8x8xf32, #tpu.memory_space<vmem>>, vector<2x8xf32>
    tpu.vector_store %arg15[%c6_45, %c0_46], %53 {strides = array<i32>} : memref<8x8xf32, #tpu.memory_space<vmem>>, vector<2x8xf32>,
    %c0_47 = arith.constant 0 : index
    %c0_48 = arith.constant 0 : index
    %55 = vector.load %arg14[%c0_47, %c0_48] : memref<8x8xf32, #tpu.memory_space<vmem>>, vector<8x8xf32>
    %cst_49 = arith.constant dense<0.000000e+00> : vector<8x8xf32>
    %56 = tpu.matmul %55, %12, %cst_49 {dimension_numbers = #tpu.dot_dimension_numbers<[1], [0], [0], [1], [0, 0, 1, 1], [], []>, precision = #tpu.contract_precision<fp32>} : vector<8x8xf32>, vector<8x8xf32>, vector<8x8xf32> -> vector<8x8xf32>
    %57 = arith.addf %56, %22 : vector<8x8xf32>
    %58 = tpu.concatenate %16, %57 in 0 : vector<10x8xf32>, vector<8x8xf32> -> vector<18x8xf32>
    %cst_50 = arith.constant dense<0.000000e+00> : vector<18x256xf32>
    %59 = tpu.matmul %58, %6, %cst_50 {dimension_numbers = #tpu.dot_dimension_numbers<[1], [0], [0], [1], [0, 0, 1, 1], [], []>, precision = #tpu.contract_precision<fp32>} : vector<18x8xf32>, vector<8x256xf32>, vector<18x256xf32> -> vector<18x256xf32>
    %60 = vector.broadcast %7 : vector<1x256xf32> to vector<18x256xf32>
    %61 = arith.addf %59, %60 : vector<18x256xf32>
    %62 = vector.extract_strided_slice %61 {offsets = [0, 0], sizes = [10, 256], strides = [1, 1]} : vector<18x256xf32> to vector<10x256xf32>
    %63 = vector.extract_strided_slice %61 {offsets = [10, 0], sizes = [8, 256], strides = [1, 1]} : vector<18x256xf32> to vector<8x256xf32>
    %64 = arith.subf %62, %1 : vector<10x256xf32>
    %65 = arith.mulf %64, %64 : vector<10x256xf32>
    %66 = vector.shape_cast %65 : vector<10x256xf32> to vector<1x10x256xf32>
    %cst_51 = arith.constant dense<0.000000e+00> : vector<1xf32>
    %67 = vector.multi_reduction <add>, %66, %cst_51 [1, 2] : vector<1x10x256xf32> to vector<1xf32>
    %68 = vector.shape_cast %67 : vector<1xf32> to vector<1x1x1xf32>
    %69 = vector.extract %68[0, 0, 0] : f32 from vector<1x1x1xf32>
    %70 = arith.subf %63, %19 : vector<8x256xf32>
    %71 = arith.mulf %70, %70 : vector<8x256xf32>
    %72 = vector.shape_cast %71 : vector<8x256xf32> to vector<1x8x256xf32>
    %cst_52 = arith.constant dense<0.000000e+00> : vector<1xf32>
    %73 = vector.multi_reduction <add>, %72, %cst_52 [1, 2] : vector<1x8x256xf32> to vector<1xf32>
    %74 = vector.shape_cast %73 : vector<1xf32> to vector<1x1x1xf32>
    %75 = vector.extract %74[0, 0, 0] : f32 from vector<1x1x1xf32>
    %c0_53 = arith.constant 0 : index
    %c0_54 = arith.constant 0 : index
    %76 = vector.load %arg15[%c0_53, %c0_54] : memref<8x8xf32, #tpu.memory_space<vmem>>, vector<8x8xf32>
    %77 = arith.subf %76, %18 : vector<8x8xf32>
    %78 = arith.mulf %77, %77 : vector<8x8xf32>
    %79 = vector.shape_cast %78 : vector<8x8xf32> to vector<1x8x8xf32>
    %cst_55 = arith.constant dense<0.000000e+00> : vector<1xf32>
    %80 = vector.multi_reduction <add>, %79, %cst_55 [1, 2] : vector<1x8x8xf32> to vector<1xf32>
    %81 = vector.shape_cast %80 : vector<1xf32> to vector<1x1x1xf32>
    %82 = vector.extract %81[0, 0, 0] : f32 from vector<1x1x1xf32>
    %83 = tpu.iota {dimensions = array<i32: 1>} : vector<1x128xi32>
    %c0_i32 = arith.constant 0 : i32
    %84 = vector.broadcast %c0_i32 : i32 to vector<1x128xi32>
    %85 = arith.cmpi eq, %83, %84 : vector<1x128xi32>
    %c1_i32 = arith.constant 1 : i32
    %86 = vector.broadcast %c1_i32 : i32 to vector<1x128xi32>
    %87 = arith.cmpi eq, %83, %86 : vector<1x128xi32>
    %c2_i32 = arith.constant 2 : i32
    %88 = vector.broadcast %c2_i32 : i32 to vector<1x128xi32>
    %89 = arith.cmpi eq, %83, %88 : vector<1x128xi32>
    %cst_56 = arith.constant 0.000000e+00 : f32
    %90 = vector.broadcast %82 : f32 to vector<1x128xf32>
    %91 = vector.broadcast %cst_56 : f32 to vector<1x128xf32>
    %92 = arith.select %89, %90, %91 : vector<1x128xi1>, vector<1x128xf32>
    %93 = vector.broadcast %75 : f32 to vector<1x128xf32>
    %94 = arith.select %87, %93, %92 : vector<1x128xi1>, vector<1x128xf32>
    %95 = vector.broadcast %69 : f32 to vector<1x128xf32>
    %96 = arith.select %85, %95, %94 : vector<1x128xi1>, vector<1x128xf32>
    %c0_57 = arith.constant 0 : index
    %c0_58 = arith.constant 0 : index
    %c0_59 = arith.constant 0 : index
    %97 = vector.load %arg13[%c0_57, %c0_58, %c0_59] : memref<1x1x128xf32, #tpu.memory_space<vmem>>, vector<1x1x128xf32>
    %98 = vector.shape_cast %97 : vector<1x1x128xf32> to vector<1x128xf32>
    %99 = vector.shape_cast %96 : vector<1x128xf32> to vector<1x1x128xf32>
    tpu.vector_store %arg13[%c0_57, %c0_58, %c0_59], %99 {strides = array<i32>} : memref<1x1x128xf32, #tpu.memory_space<vmem>>, vector<1x1x128xf32>,
    return
  }
  func.func @transform_0(%arg0: i32) -> (i32, i32, i32) {
    %c0_i32 = arith.constant 0 : i32
    %c0_i32_0 = arith.constant 0 : i32
    %c0_i32_1 = arith.constant 0 : i32
    return %arg0, %c0_i32, %c0_i32_0 : i32, i32, i32
  }
  func.func @transform_1(%arg0: i32) -> (i32, i32, i32) {
    %c0_i32 = arith.constant 0 : i32
    %c0_i32_0 = arith.constant 0 : i32
    %c0_i32_1 = arith.constant 0 : i32
    return %arg0, %c0_i32, %c0_i32_0 : i32, i32, i32
  }
  func.func @transform_2(%arg0: i32) -> (i32, i32) {
    %c0_i32 = arith.constant 0 : i32
    %c0_i32_0 = arith.constant 0 : i32
    %c0_i32_1 = arith.constant 0 : i32
    return %c0_i32, %c0_i32_0 : i32, i32
  }
  func.func @transform_3(%arg0: i32) -> (i32, i32) {
    %c0_i32 = arith.constant 0 : i32
    %c0_i32_0 = arith.constant 0 : i32
    %c0_i32_1 = arith.constant 0 : i32
    return %c0_i32, %c0_i32_0 : i32, i32
  }
  func.func @transform_4(%arg0: i32) -> (i32, i32) {
    %c0_i32 = arith.constant 0 : i32
    %c0_i32_0 = arith.constant 0 : i32
    %c0_i32_1 = arith.constant 0 : i32
    return %c0_i32, %c0_i32_0 : i32, i32
  }
  func.func @transform_5(%arg0: i32) -> (i32, i32) {
    %c0_i32 = arith.constant 0 : i32
    %c0_i32_0 = arith.constant 0 : i32
    %c0_i32_1 = arith.constant 0 : i32
    return %c0_i32, %c0_i32_0 : i32, i32
  }
  func.func @transform_6(%arg0: i32) -> (i32, i32) {
    %c0_i32 = arith.constant 0 : i32
    %c0_i32_0 = arith.constant 0 : i32
    %c0_i32_1 = arith.constant 0 : i32
    return %c0_i32, %c0_i32_0 : i32, i32
  }
  func.func @transform_7(%arg0: i32) -> (i32, i32) {
    %c0_i32 = arith.constant 0 : i32
    %c0_i32_0 = arith.constant 0 : i32
    %c0_i32_1 = arith.constant 0 : i32
    return %c0_i32, %c0_i32_0 : i32, i32
  }
  func.func @transform_8(%arg0: i32) -> (i32, i32) {
    %c0_i32 = arith.constant 0 : i32
    %c0_i32_0 = arith.constant 0 : i32
    %c0_i32_1 = arith.constant 0 : i32
    return %c0_i32, %c0_i32_0 : i32, i32
  }
  func.func @transform_9(%arg0: i32) -> (i32, i32) {
    %c0_i32 = arith.constant 0 : i32
    %c0_i32_0 = arith.constant 0 : i32
    %c0_i32_1 = arith.constant 0 : i32
    return %c0_i32, %c0_i32_0 : i32, i32
  }
  func.func @transform_10(%arg0: i32) -> (i32, i32) {
    %c0_i32 = arith.constant 0 : i32
    %c0_i32_0 = arith.constant 0 : i32
    %c0_i32_1 = arith.constant 0 : i32
    return %c0_i32, %c0_i32_0 : i32, i32
  }
  func.func @transform_11(%arg0: i32) -> (i32, i32) {
    %c0_i32 = arith.constant 0 : i32
    %c0_i32_0 = arith.constant 0 : i32
    %c0_i32_1 = arith.constant 0 : i32
    return %c0_i32, %c0_i32_0 : i32, i32
  }
  func.func @transform_12(%arg0: i32) -> (i32, i32, i32) {
    %c0_i32 = arith.constant 0 : i32
    %c0_i32_0 = arith.constant 0 : i32
    %c0_i32_1 = arith.constant 0 : i32
    return %arg0, %c0_i32, %c0_i32_0 : i32, i32, i32
  }
}

</mosaic_0001>

<bundles_post_ra>
// kernel: mul.4
= control target key start
LH: loop header
LB: loop body
LE: loop exit
PB: predicated region body
PF: predicated region fallthrough
CT: control target
= control target key end

     0   :  { %s56_s0 = inlined_call_operand.vmem [shape: f32[13,8], index: 0, kind: input, shape index: {}]   ;;  %s57_s1 = inlined_call_operand.vmem [shape: f32[13,8], index: 1, kind: input, shape index: {}]   ;;  %s58_s2 = inlined_call_operand.vmem [shape: f32[13,8], index: 2, kind: output, shape index: {}]  }
   0x1   :  { %v3_v0 = vld [vmem:[%s56_s0] sm:$0xff]  ;;  %v20_v2 = vld [vmem:[%s56_s0 + $0x8] sm:$0xff] }
   0x2   :  { %v4_v1 = vld [vmem:[%s57_s1] sm:$0xff]  ;;  %v21_v4 = vld [vmem:[%s57_s1 + $0x8] sm:$0xff] }
   0x3   :  { %v7_v3 = vmul.f32 %v4_v1, %v3_v0  ;;  %v16_v5 = vmul.f32 %v21_v4, %v20_v2 }
   0x5   :  { %9 = vst [vmem:[%s58_s2] sm:$0xff] %v7_v3  ;;  %22 = vst [vmem:[%s58_s2 + $0x8] sm:$0xff] %v16_v5 }

// kernel: multi_step_loss.1
= control target key start
LH: loop header
LB: loop body
LE: loop exit
PB: predicated region body
PF: predicated region fallthrough
CT: control target
= control target key end

     0   :  { %vm1022_vm0 = vcmask 1043456   ;;  %vm1018_vm1 = vcmask 31744   ;;  %vm6873_vm2 = vmmov 0   ;;  %vm1928_vm3 = vcmask 58368   ;;  %s8116_s2 = inlined_call_operand.vmem [shape: f32[256,8], index: 2, kind: input, shape index: {}]   ;;  %s8117_s0 = inlined_call_operand.vmem [shape: f32[1,10,256], index: 0, kind: input, shape index: {}]   ;;  %s8118_s11 = inlined_call_operand.vmem [shape: f32[4,8], index: 11, kind: input, shape index: {}]   ;;  %s8119_s1 = inlined_call_operand.vmem [shape: f32[1,8,4], index: 1, kind: input, shape index: {}]   ;;  %s8120_s6 = inlined_call_operand.vmem [shape: f32[8,8], index: 6, kind: input, shape index: {}]   ;;  %s8121_s3 = inlined_call_operand.vmem [shape: f32[1,8], index: 3, kind: input, shape index: {}]   ;;  %s8122_s9 = inlined_call_operand.vmem [shape: f32[1,8], index: 9, kind: input, shape index: {}]   ;;  %s8123_s10 = inlined_call_operand.vmem [shape: f32[8,8], index: 10, kind: input, shape index: {}]   ;;  %s8124_s8 = inlined_call_operand.vmem [shape: f32[8,8], index: 8, kind: input, shape index: {}]   ;;  %s8125_s7 = inlined_call_operand.vmem [shape: f32[1,8], index: 7, kind: input, shape index: {}]   ;;  %s8126_s4 = inlined_call_operand.vmem [shape: f32[8,256], index: 4, kind: input, shape index: {}]   ;;  %s8127_s5 = inlined_call_operand.vmem [shape: f32[1,256], index: 5, kind: input, shape index: {}]   ;;  %s8128_s12 = inlined_call_operand.vmem [shape: f32[1,1,128], index: 12, kind: output, shape index: {}]  }
   0x1   :  { %v77_v0 = vld [vmem:[%s8116_s2 + $0xf8] sm:$0xff]  ;;  %v76_v2 = vld [vmem:[%s8116_s2 + $0xf0] sm:$0xff]  ;;  %v75_v7 = vld [vmem:[%s8116_s2 + $0xe8] sm:$0xff]  ;;  %vm6156_vm4 = vcmask 1045504   ;;  %vm1478_vm5 = vcmask 64512   ;;  %vm5541_vm6 = vcmask 1041408  }
   0x2   :  { %v61_v1 = vld [vmem:[%s8116_s2 + $0x78] sm:$0xff]  ;;  %v6948_v3 = vand.u32 4294901760, %v77_v0  ;;  %v6952_v5 = vand.u32 4294901760, %v76_v2  ;;  %v60_v6 = vld [vmem:[%s8116_s2 + $0x70] sm:$0xff]  ;;  %v59_v8 = vld [vmem:[%s8116_s2 + $0x68] sm:$0xff]  ;;  %v6965_v10 = vand.u32 4294901760, %v75_v7 }
   0x3   :  { %v6950_v4 = vand.u32 4294901760, %v61_v1  ;;  %v6963_v9 = vand.u32 4294901760, %v60_v6  ;;  %v6967_v11 = vand.u32 4294901760, %v59_v8  ;;  %v74_v12 = vld [vmem:[%s8116_s2 + $0xe0] sm:$0xff]  ;;  %v73_v14 = vld [vmem:[%s8116_s2 + $0xd8] sm:$0xff]  ;;  %v6996_v20 = vld [vmem:[%s8116_s2 + $0xd0] sm:$0xff] }
   0x4   :  { %v58_v13 = vld [vmem:[%s8116_s2 + $0x60] sm:$0xff]  ;;  %6212 = vmatprep.subr.mxu0 %v6948_v3  ;;  %v6979_v15 = vand.u32 4294901760, %v74_v12  ;;  %v6983_v17 = vand.u32 4294901760, %v73_v14  ;;  %v6986_v18 = vsub.f32 %v77_v0, %v6948_v3  ;;  %v6991_v19 = vld [vmem:[%s8116_s2 + $0x58] sm:$0xff]  ;;  %v7001_v21 = vld [vmem:[%s8116_s2 + $0x50] sm:$0xff]  ;;  %v7011_v24 = vand.u32 4294901760, %v6996_v20 }
   0x5   :  { %v6981_v16 = vand.u32 4294901760, %v58_v13  ;;  %6213 = vmatpush3.msra.mxu0 %v6950_v4  ;;  %v7005_v22 = vand.u32 4294901760, %v6991_v19  ;;  %v7008_v23 = vsub.f32 %v61_v1, %v6950_v4  ;;  %v7014_v25 = vsub.f32 %v76_v2, %v6952_v5  ;;  %v7019_v26 = vld [vmem:[%s8116_s2 + $0xc8] sm:$0xff]  ;;  %v7029_v28 = vld [vmem:[%s8116_s2 + $0xc0] sm:$0xff]  ;;  %v7081_v46 = vld [vmem:[%s8116_s2 + $0xb8] sm:$0xff] }
   0x6   :  { %v7024_v27 = vld [vmem:[%s8116_s2 + $0x48] sm:$0xff]  ;;  %6214 = vmatprep.subr.mxu0 %v6952_v5  ;;  %v8142_v29 = vand.u32 4294901760, %v6986_v18  ;;  %v7034_v30 = vand.u32 4294901760, %v7001_v21  ;;  %v7037_v31 = vsub.f32 %v60_v6, %v6963_v9  ;;  %v7040_v32 = vand.u32 4294901760, %v7019_v26  ;;  %v7054_v37 = vld [vmem:[%s8116_s2 + $0x40] sm:$0xff]  ;;  %v7094_v51 = vld [vmem:[%s8116_s2 + $0x38] sm:$0xff] }
   0x7   :  { %6215 = vmatpush3.msra.mxu0 %v6963_v9  ;;  %v8141_v33 = vand.u32 4294901760, %v7008_v23  ;;  %v8139_v34 = vand.u32 4294901760, %v7014_v25  ;;  %v7046_v35 = vsub.f32 %v75_v7, %v6965_v10  ;;  %v7049_v36 = vand.u32 4294901760, %v7024_v27  ;;  %v7104_v56 = vld [vmem:[%s8116_s2 + $0xb0] sm:$0xff]  ;;  %v7134_v2 = vld [vmem:[%s8116_s2 + $0xa8] sm:$0xff] }
   0x8   :  { %8202 = vst [vmem:[#allocation4_spill] sm:$0xff] %v7034_v30  ;;  %8203 = vst [vmem:[#allocation5_spill] sm:$0xff] %v7040_v32  ;;  %6216 = vmatprep.subr.mxu0 %v6965_v10  ;;  %v337_v38 = vsub.f32 %v6986_v18, %v8142_v29  ;;  %v8138_v39 = vand.u32 4294901760, %v7037_v31  ;;  %v7062_v40 = vsub.f32 %v59_v8, %v6967_v11  ;;  %v7065_v41 = vand.u32 4294901760, %v7029_v28  ;;  %v7119_v61 = vld [vmem:[%s8116_s2 + $0x30] sm:$0xff] }
   0x9   :  { %8204 = vst [vmem:[#allocation6_spill] sm:$0xff] %v7049_v36  ;;  %6217 = vmatpush3.msra.mxu0 %v6967_v11  ;;  %v225_v42 = vsub.f32 %v7008_v23, %v8141_v33  ;;  %v344_v43 = vsub.f32 %v7014_v25, %v8139_v34  ;;  %v8136_v44 = vand.u32 4294901760, %v7046_v35  ;;  %v7076_v45 = vsub.f32 %v74_v12, %v6979_v15  ;;  %v7270_v33 = vld [vmem:[%s8116_s2 + $0x88] sm:$0xff] }
   0xa   :  { %8205 = vst [vmem:[#allocation7_spill] sm:$0xff] %v7065_v41  ;;  %6218 = vmatprep.subr.mxu0 %v6979_v15  ;;  %v338_v47 = vand.u32 4294901760, %v337_v38  ;;  %v232_v48 = vsub.f32 %v7037_v31, %v8138_v39  ;;  %v8134_v49 = vand.u32 4294901760, %v7062_v40  ;;  %v7089_v50 = vand.u32 4294901760, %v7054_v37 }
   0xb   :  { %6219 = vmatpush3.msra.mxu0 %v6981_v16  ;;  %v226_v52 = vand.u32 4294901760, %v225_v42  ;;  %v345_v53 = vand.u32 4294901760, %v344_v43  ;;  %v351_v54 = vsub.f32 %v7046_v35, %v8136_v44  ;;  %v8133_v55 = vand.u32 4294901760, %v7076_v45  ;;  %v7243_v44 = vld [vmem:[%s8116_s2 + $0x90] sm:$0xff] }
   0xc   :  { %8206 = vst [vmem:[#allocation8_spill] sm:$0xff] %v7089_v50  ;;  %6220 = vmatprep.subr.mxu0 %v6983_v17  ;;  %6250 = vmatprep.subr.mxu1 %v338_v47  ;;  %v233_v57 = vand.u32 4294901760, %v232_v48  ;;  %v239_v58 = vsub.f32 %v7062_v40, %v8134_v49  ;;  %v7111_v59 = vsub.f32 %v58_v13, %v6981_v16  ;;  %v7114_v60 = vand.u32 4294901760, %v7081_v46  ;;  %v7148_v13 = vld [vmem:[%s8116_s2 + $0x28] sm:$0xff]  ;;  %v7227_v49 = vld [vmem:[%s8116_s2 + $0x18] sm:$0xff] }
   0xd   :  { %6221 = vmatpush3.msra.mxu0 %v7005_v22  ;;  %6251 = vmatpush3.msra.mxu1 %v226_v52  ;;  %v352_v62 = vand.u32 4294901760, %v351_v54  ;;  %v358_v63 = vsub.f32 %v7076_v45, %v8133_v55  ;;  %v7126_v0 = vsub.f32 %v73_v14, %v6983_v17  ;;  %v7129_v1 = vand.u32 4294901760, %v7094_v51 }
   0xe   :  { %8207 = vst [vmem:[#allocation9_spill] sm:$0xff] %v7114_v60  ;;  %6222 = vmatprep.subr.mxu0 %v7011_v24  ;;  %6252 = vmatprep.subr.mxu1 %v345_v53  ;;  %v240_v6 = vand.u32 4294901760, %v239_v58  ;;  %v8131_v7 = vand.u32 4294901760, %v7111_v59  ;;  %v7140_v8 = vsub.f32 %v6991_v19, %v7005_v22  ;;  %v7143_v12 = vand.u32 4294901760, %v7104_v56 }
   0xf   :  { %8208 = vst [vmem:[#allocation10_spill] sm:$0xff] %v7129_v1  ;;  %6223 = vmatpush3.msra.mxu0 %v7034_v30  ;;  %6253 = vmatpush3.msra.mxu1 %v233_v57  ;;  %v359_v14 = vand.u32 4294901760, %v358_v63  ;;  %v8129_v38 = vand.u32 4294901760, %v7126_v0  ;;  %v7154_v42 = vsub.f32 %v6996_v20, %v7011_v24  ;;  %v7157_v19 = vand.u32 4294901760, %v7119_v61  ;;  %v7174_v20 = vld [vmem:[%s8116_s2 + $0xa0] sm:$0xff] }
  0x10   :  { %8209 = vst [vmem:[#allocation11_spill] sm:$0xff] %v7143_v12  ;;  %6224 = vmatprep.subr.mxu0 %v7040_v32  ;;  %6254 = vmatprep.subr.mxu1 %v352_v62  ;;  %v246_v43 = vsub.f32 %v7111_v59, %v8131_v7  ;;  %v8130_v47 = vand.u32 4294901760, %v7140_v8  ;;  %v7166_v48 = vsub.f32 %v7001_v21, %v7034_v30  ;;  %v7169_v52 = vand.u32 4294901760, %v7134_v2 }
  0x11   :  { %8210 = vst [vmem:[#allocation12_spill] sm:$0xff] %v7157_v19  ;;  %6225 = vmatpush3.msra.mxu0 %v7049_v36  ;;  %6255 = vmatpush3.msra.mxu1 %v240_v6  ;;  %v365_v53 = vsub.f32 %v7126_v0, %v8129_v38  ;;  %v8132_v54 = vand.u32 4294901760, %v7154_v42  ;;  %v7183_v21 = vsub.f32 %v7019_v26, %v7040_v32  ;;  %v7186_v57 = vand.u32 4294901760, %v7148_v13  ;;  %v7200_v26 = vld [vmem:[%s8116_s2 + $0x20] sm:$0xff] }
  0x12   :  { %8211 = vst [vmem:[#allocation13_spill] sm:$0xff] %v7169_v52  ;;  %6226 = vmatprep.subr.mxu0 %v7065_v41  ;;  %6256 = vmatprep.subr.mxu1 %v359_v14  ;;  %v247_v58 = vand.u32 4294901760, %v246_v43  ;;  %v253_v62 = vsub.f32 %v7140_v8, %v8130_v47  ;;  %v8135_v63 = vand.u32 4294901760, %v7166_v48  ;;  %v7195_v6 = vsub.f32 %v7024_v27, %v7049_v36  ;;  %v7213_v27 = vld [vmem:[%s8116_s2 + $0x98] sm:$0xff] }
  0x13   :  { %8212 = vst [vmem:[#allocation14_spill] sm:$0xff] %v7186_v57  ;;  %6227 = vmatpush3.msra.mxu0 %v7089_v50  ;;  %v366_v38 = vand.u32 4294901760, %v365_v53  ;;  %v372_v14 = vsub.f32 %v7154_v42, %v8132_v54  ;;  %v8137_v43 = vand.u32 4294901760, %v7183_v21  ;;  %v7208_v47 = vand.u32 4294901760, %v7174_v20 }
  0x14   :  { %6257 = vmatpush3.msra.mxu1 %v247_v58  ;;  %6228 = vmatprep.subr.mxu0 %v7114_v60  ;;  %v254_v7 = vand.u32 4294901760, %v253_v62  ;;  %v260_v53 = vsub.f32 %v7166_v48, %v8135_v63  ;;  %v8140_v54 = vand.u32 4294901760, %v7195_v6  ;;  %v7222_v55 = vsub.f32 %v7029_v28, %v7065_v41  ;;  %v41_v41 = vld [vmem:[%s8117_s0] sm:$0xff] }
  0x15   :  { %8213 = vst [vmem:[#allocation15_spill] sm:$0xff] %v7208_v47  ;;  %6258 = vmatprep.subr.mxu1 %v366_v38  ;;  %6229 = vmatpush3.msra.mxu0 %v7129_v1  ;;  %v373_v58 = vand.u32 4294901760, %v372_v14  ;;  %v379_v62 = vsub.f32 %v7183_v21, %v8137_v43  ;;  %v7234_v63 = vand.u32 4294901760, %v7200_v26  ;;  %v7238_v28 = vsub.f32 %v7054_v37, %v7089_v50  ;;  %v7256_v37 = vld [vmem:[%s8116_s2 + $0x10] sm:$0xff] }
  0x16   :  { %6259 = vmatpush3.msra.mxu1 %v254_v7  ;;  %6230 = vmatprep.subr.mxu0 %v7143_v12  ;;  %v261_v38 = vand.u32 4294901760, %v260_v53  ;;  %v267_v14 = vsub.f32 %v7195_v6, %v8140_v54  ;;  %v8145_v43 = vand.u32 4294901760, %v7222_v55  ;;  %v7251_v39 = vand.u32 4294901760, %v7213_v27 }
  0x17   :  { %8214 = vst [vmem:[#allocation16_spill] sm:$0xff] %v7234_v63  ;;  %6260 = vmatprep.subr.mxu1 %v373_v58  ;;  %6231 = vmatpush3.msra.mxu0 %v7157_v19  ;;  %v380_v7 = vand.u32 4294901760, %v379_v62  ;;  %v8146_v53 = vand.u32 4294901760, %v7238_v28  ;;  %v7262_v34 = vsub.f32 %v7081_v46, %v7114_v60  ;;  %v7265_v54 = vand.u32 4294901760, %v7227_v49 }
  0x18   :  { %8215 = vst [vmem:[#allocation17_spill] sm:$0xff] %v7251_v39  ;;  %6261 = vmatpush3.msra.mxu1 %v261_v38  ;;  %6232 = vmatprep.subr.mxu0 %v7169_v52  ;;  %v268_v58 = vand.u32 4294901760, %v267_v14  ;;  %v386_v62 = vsub.f32 %v7222_v55, %v8145_v43  ;;  %v7278_v46 = vsub.f32 %v7094_v51, %v7129_v1  ;;  %v7281_v29 = vand.u32 4294901760, %v7243_v44  ;;  %v7298_v51 = vld [vmem:[%s8116_s2 + $0x8] sm:$0xff] }
  0x19   :  { %8216 = vst [vmem:[#allocation18_spill] sm:$0xff] %v7265_v54  ;;  %6262 = vmatprep.subr.mxu1 %v380_v7  ;;  %6233 = vmatpush3.msra.mxu0 %v7186_v57  ;;  %v274_v38 = vsub.f32 %v7238_v28, %v8146_v53  ;;  %v7290_v60 = vsub.f32 %v7104_v56, %v7143_v12  ;;  %v7293_v43 = vand.u32 4294901760, %v7256_v37  ;;  %v7307_v56 = vand.u32 4294901760, %v7270_v33  ;;  %v7312_v12 = vld [vmem:[%s8116_s2 + $0x80] sm:$0xff] }
  0x1a   :  { %8217 = vst [vmem:[#allocation19_spill] sm:$0xff] %v7281_v29  ;;  %6263 = vmatpush3.msra.mxu1 %v268_v58  ;;  %6234 = vmatprep.subr.mxu0 %v7208_v47  ;;  %v387_v7 = vand.u32 4294901760, %v386_v62  ;;  %v7304_v14 = vsub.f32 %v7119_v61, %v7157_v19  ;;  %v8221_v1 = vand.u32 4294901760, %v7262_v34  ;;  %v7321_v61 = vsub.f32 %v7134_v2, %v7169_v52  ;;  %v7338_v2 = vld [vmem:[%s8116_s2] sm:$0xff] }
  0x1b   :  { %8218 = vst [vmem:[#allocation20_spill] sm:$0xff] %v7293_v43  ;;  %8220 = vst [vmem:[#allocation22_spill] sm:$0xff] %v7307_v56  ;;  %6235 = vmatpush3.msra.mxu0 %v7234_v63  ;;  %v275_v58 = vand.u32 4294901760, %v274_v38  ;;  %v8163_v53 = vand.u32 4294901760, %v7290_v60  ;;  %v8223_v19 = vand.u32 4294901760, %v7278_v46  ;;  %v7329_v38 = vand.u32 4294901760, %v7298_v51 }
  0x1c   :  { %8219 = vst [vmem:[#allocation21_spill] sm:$0xff] %v7304_v14  ;;  %v393_v62 = vsub.f32 %v7262_v34, %v8221_v1  ;;  %8222 = vst [vmem:[#allocation23_spill] sm:$0xff] %v7321_v61  ;;  %6264 = vmatprep.subr.mxu1 %v387_v7  ;;  %6236 = vmatprep.subr.mxu0 %v7251_v39  ;;  %v7333_v1 = vsub.f32 %v7148_v13, %v7186_v57  ;;  %v7346_v52 = vand.u32 4294901760, %v7312_v12  ;;  %v42_v13 = vld [vmem:[%s8117_s0 + $0x8] sm:$0xff] }
  0x1d   :  { %v281_v50 = vsub.f32 %v7278_v46, %v8223_v19  ;;  %6265 = vmatpush3.msra.mxu1 %v275_v58  ;;  %6237 = vmatpush3.msra.mxu0 %v7265_v54  ;;  %v400_v19 = vsub.f32 %v7290_v60, %v8163_v53  ;;  %v8225_v58 = vand.u32 4294901760, %v7304_v14  ;;  %v7358_v53 = vsub.f32 %v7174_v20, %v7208_v47 }
  0x1e   :  { %8224 = vst [vmem:[#allocation24_spill] sm:$0xff] %v7333_v1  ;;  %v394_v7 = vand.u32 4294901760, %v393_v62  ;;  %6238 = vmatprep.subr.mxu0 %v7281_v29  ;;  %v7372_v36 = vsub.f32 %v7200_v26, %v7234_v63  ;;  %v7387_v26 = vand.u32 4294901760, %v41_v41 }
  0x1f   :  { %v282_v57 = vand.u32 4294901760, %v281_v50  ;;  %v288_v62 = vsub.f32 %v7304_v14, %v8225_v58  ;;  %v401_v32 = vand.u32 4294901760, %v400_v19  ;;  %6239 = vmatpush3.msra.mxu0 %v7293_v43  ;;  %v8226_v50 = vand.u32 4294901760, %v7321_v61 }
  0x20   :  { %6266 = vmatprep.subr.mxu1 %v394_v7  ;;  %v7368_v58 = vand.u32 4294901760, %v7338_v2  ;;  %8227 = vst [vmem:[#allocation25_spill] sm:$0xff] %v7372_v36  ;;  %6240 = vmatprep.subr.mxu0 %v7307_v56  ;;  %v8228_v7 = vand.u32 4294901760, %v7333_v1  ;;  %v8174_v47 = vand.u32 4294901760, %v7358_v53  ;;  %v7379_v14 = vand.u32 4294901760, %v42_v13  ;;  %8230 = vst [vmem:[#allocation27_spill] sm:$0xff] %v7387_v26 }
  0x21   :  { %v407_v30 = vsub.f32 %v7321_v61, %v8226_v50  ;;  %6267 = vmatpush3.msra.mxu1 %v282_v57  ;;  %v289_v20 = vand.u32 4294901760, %v288_v62  ;;  %6241 = vmatpush3.msra.mxu0 %v7329_v38  ;;  %v8175_v61 = vand.u32 4294901760, %v7372_v36  ;;  %v7385_v57 = vsub.f32 %v7213_v27, %v7251_v39 }
  0x22   :  { %v295_v19 = vsub.f32 %v7333_v1, %v8228_v7  ;;  %8229 = vst [vmem:[#allocation26_spill] sm:$0xff] %v7379_v14  ;;  %6268 = vmatprep.subr.mxu1 %v401_v32  ;;  %6242 = vmatprep.subr.mxu0 %v7346_v52  ;;  %v414_v7 = vsub.f32 %v7358_v53, %v8174_v47 }
  0x23   :  { %v408_v50 = vand.u32 4294901760, %v407_v30  ;;  %6269 = vmatpush3.msra.mxu1 %v289_v20  ;;  %v7394_v30 = vsub.f32 %v42_v13, %v7379_v14  ;;  %v7398_v32 = vsub.f32 %v7227_v49, %v7265_v54  ;;  %6243 = vmatpush3.msra.mxu0 %v7368_v58  ;;  %v302_v27 = vsub.f32 %v7372_v36, %v8175_v61 }
  0x24   :  { %v296_v62 = vand.u32 4294901760, %v295_v19  ;;  %v7406_v19 = vsub.f32 %v41_v41, %v7387_v26  ;;  %v7410_v13 = vsub.f32 %v7243_v44, %v7281_v29  ;;  %v415_v47 = vand.u32 4294901760, %v414_v7  ;;  %6288 = vmatprep.subr.mxu0 %v6986_v18  ;;  %446 = vmatprep.mubr.f32.mxu1 %v7379_v14 }
  0x25   :  { %8231 = vst [vmem:[#allocation28_spill] sm:$0xff] %v7398_v32  ;;  %6270 = vmatprep.subr.mxu1 %v408_v50  ;;  %v8180_v49 = vand.u32 4294901760, %v7394_v30  ;;  %v8183_v50 = vand.u32 4294901760, %v7398_v32  ;;  %v7417_v61 = vsub.f32 %v7256_v37, %v7293_v43  ;;  %v303_v20 = vand.u32 4294901760, %v302_v27 }
  0x26   :  { %6271 = vmatpush3.msra.mxu1 %v296_v62  ;;  %v8232_v41 = vand.u32 4294901760, %v7385_v57  ;;  %v8233_v62 = vand.u32 4294901760, %v7406_v19  ;;  %v8234_v14 = vand.u32 4294901760, %v7410_v13  ;;  %v7444_v43 = vsub.f32 %v7298_v51, %v7329_v38 }
  0x27   :  { %6272 = vmatprep.subr.mxu1 %v415_v47  ;;  %v193_v7 = vsub.f32 %v7394_v30, %v8180_v49  ;;  %v309_v37 = vsub.f32 %v7398_v32, %v8183_v50  ;;  %v8235_v29 = vand.u32 4294901760, %v7417_v61 }
  0x28   :  { %v421_v54 = vsub.f32 %v7385_v57, %v8232_v41  ;;  %v7434_v41 = vsub.f32 %v7270_v33, %v7307_v56  ;;  %6273 = vmatpush3.msra.mxu1 %v303_v20  ;;  %v199_v47 = vsub.f32 %v7406_v19, %v8233_v62  ;;  %v428_v49 = vsub.f32 %v7410_v13, %v8234_v14 }
  0x29   :  { %v194_v50 = vand.u32 4294901760, %v193_v7  ;;  %v310_v27 = vand.u32 4294901760, %v309_v37  ;;  %v316_v33 = vsub.f32 %v7417_v61, %v8235_v29  ;;  %v8190_v62 = vand.u32 4294901760, %v7444_v43 }
  0x2a   :  { %v422_v44 = vand.u32 4294901760, %v421_v54  ;;  %v8191_v54 = vand.u32 4294901760, %v7434_v41  ;;  %v200_v20 = vand.u32 4294901760, %v199_v47  ;;  %v429_v56 = vand.u32 4294901760, %v428_v49  ;;  %v44_v47 = vld [vmem:[%s8117_s0 + $0x18] sm:$0x3] }
  0x2b   :  { %v7453_v14 = vsub.f32 %v7312_v12, %v7346_v52  ;;  %195 = vmatprep.mubr.f32.mxu0 %v194_v50  ;;  %v317_v51 = vand.u32 4294901760, %v316_v33  ;;  %v7460_v29 = vsub.f32 %v7338_v2, %v7368_v58  ;;  %v323_v49 = vsub.f32 %v7444_v43, %v8190_v62  ;;  %v8242_v62 = vld [vmem:[#allocation7_spill] sm:$0xff] }
  0x2c   :  { %6274 = vmatprep.subr.mxu1 %v422_v44  ;;  %v435_v7 = vsub.f32 %v7434_v41, %v8191_v54  ;;  %201 = vmatmul.mubr.f32.vlgmr.msra.gmra.mxu0 %v200_v20  ;;  %v43_v20 = vld [vmem:[%s8117_s0 + $0x10] sm:$0x3] }
  0x2d   :  { %6275 = vmatpush3.msra.mxu1 %v310_v27  ;;  %8236 = vst [vmem:[#allocation29_spill] sm:$0xff] %v7460_v29  ;;  %v8189_v12 = vand.u32 4294901760, %v7453_v14  ;;  %6289 = vmatpush3.msra.mxu0 %v7008_v23  ;;  %v8188_v44 = vand.u32 4294901760, %v7460_v29  ;;  %v324_v37 = vand.u32 4294901760, %v323_v49 }
  0x2e   :  { %6276 = vmatprep.subr.mxu1 %v429_v56  ;;  %v436_v50 = vand.u32 4294901760, %v435_v7  ;;  %6290 = vmatprep.subr.mxu0 %v7014_v25  ;;  %v7492_v7 = vand.u32 4294901760, %v43_v20 }
  0x2f   :  { %6277 = vmatpush3.msra.mxu1 %v317_v51  ;;  %v442_v2 = vsub.f32 %v7453_v14, %v8189_v12  ;;  %6291 = vmatpush3.msra.mxu0 %v7037_v31  ;;  %v330_v56 = vsub.f32 %v7460_v29, %v8188_v44  ;;  %v7486_v51 = vand.u32 4294901760, %v44_v47  ;;  %v8241_v12 = vld [vmem:[#allocation6_spill] sm:$0xff] }
  0x30   :  { %6278 = vmatprep.subr.mxu1 %v436_v50  ;;  %6292 = vmatprep.subr.mxu0 %v7046_v35  ;;  %v7506_v50 = vsub.f32 %v43_v20, %v7492_v7  ;;  %v8240_v20 = vld [vmem:[#allocation5_spill] sm:$0xff] }
  0x31   :  { %6279 = vmatpush3.msra.mxu1 %v324_v37  ;;  %v443_v27 = vand.u32 4294901760, %v442_v2  ;;  %6293 = vmatpush3.msra.mxu0 %v7062_v40  ;;  %v331_v33 = vand.u32 4294901760, %v330_v56  ;;  %v7499_v49 = vsub.f32 %v44_v47, %v7486_v51  ;;  %v8237_v56 = vld [vmem:[#allocation21_spill] sm:$0xff]  ;;  %v8238_v47 = vld [vmem:[#allocation4_spill] sm:$0xff] }
  0x32   :  { %6294 = vmatprep.subr.mxu0 %v7076_v45  ;;  %v8196_v2 = vand.u32 4294901760, %v7506_v50 }
  0x33   :  { %6280 = vmatprep.subr.mxu1 %v443_v27  ;;  %6295 = vmatpush3.msra.mxu0 %v7111_v59  ;;  %v8192_v37 = vand.u32 4294901760, %v7499_v49 }
  0x34   :  { %6281 = vmatpush3.msra.mxu1 %v331_v33  ;;  %6296 = vmatprep.subr.mxu0 %v7126_v0  ;;  %v8239_v33 = vld [vmem:[#allocation23_spill] sm:$0xff]  ;;  %v214_v44 = vsub.f32 %v7506_v50, %v8196_v2 }
  0x35   :  { %448 = vmatmul.mubr.f32.vlgmr.msra.gmra.mxu1 %v7387_v26  ;;  %6326 = vmatprep.subr.mxu1 %v6948_v3  ;;  %v208_v27 = vsub.f32 %v7499_v49, %v8192_v37  ;;  %v8243_v37 = vld [vmem:[#allocation8_spill] sm:$0xff]  ;;  %v8244_v26 = vld [vmem:[#allocation9_spill] sm:$0xff]  ;;  %v8246_v2 = vld [vmem:[#allocation11_spill] sm:$0xff] }
  0x36   :  { %6297 = vmatpush3.msra.mxu0 %v7140_v8  ;;  %6327 = vmatpush3.msra.mxu1 %v6950_v4 }
  0x37   :  { %6298 = vmatprep.subr.mxu0 %v7154_v42  ;;  %6328 = vmatprep.subr.mxu1 %v6952_v5  ;;  %v209_v54 = vand.u32 4294901760, %v208_v27  ;;  %v8248_v27 = vld [vmem:[#allocation13_spill] sm:$0xff] }
  0x38   :  { %6299 = vmatpush3.msra.mxu0 %v7166_v48  ;;  %6329 = vmatpush3.msra.mxu1 %v6963_v9 }
  0x39   :  { %6300 = vmatprep.subr.mxu0 %v7183_v21  ;;  %6330 = vmatprep.subr.mxu1 %v6965_v10 }
  0x3a   :  { %6301 = vmatpush3.msra.mxu0 %v7195_v6  ;;  %6331 = vmatpush3.msra.mxu1 %v6967_v11 }
  0x3b   :  { %6302 = vmatprep.subr.mxu0 %v7222_v55  ;;  %6332 = vmatprep.subr.mxu1 %v6979_v15 }
  0x3c   :  { %6303 = vmatpush3.msra.mxu0 %v7238_v28  ;;  %6333 = vmatpush3.msra.mxu1 %v6981_v16 }
  0x3d   :  { %6304 = vmatprep.subr.mxu0 %v7262_v34  ;;  %6334 = vmatprep.subr.mxu1 %v6983_v17 }
  0x3e   :  { %6305 = vmatpush3.msra.mxu0 %v7278_v46  ;;  %6335 = vmatpush3.msra.mxu1 %v7005_v22 }
  0x3f   :  { %6306 = vmatprep.subr.mxu0 %v7290_v60  ;;  %6336 = vmatprep.subr.mxu1 %v7011_v24 }
  0x40   :  { %6307 = vmatpush3.msra.mxu0 %v8237_v56  ;;  %6337 = vmatpush3.msra.mxu1 %v8238_v47 }
  0x41   :  { %6308 = vmatprep.subr.mxu0 %v8239_v33  ;;  %6338 = vmatprep.subr.mxu1 %v8240_v20  ;;  %v8245_v20 = vld [vmem:[#allocation10_spill] sm:$0xff] }
  0x42   :  { %6309 = vmatpush3.msra.mxu0 %v7333_v1  ;;  %6339 = vmatpush3.msra.mxu1 %v8241_v12  ;;  %v215_v1 = vand.u32 4294901760, %v214_v44  ;;  %v8250_v44 = vld [vmem:[#allocation15_spill] sm:$0xff] }
  0x43   :  { %6310 = vmatprep.subr.mxu0 %v7358_v53  ;;  %6340 = vmatprep.subr.mxu1 %v8242_v62 }
  0x44   :  { %6311 = vmatpush3.msra.mxu0 %v7372_v36  ;;  %6341 = vmatpush3.msra.mxu1 %v8243_v37  ;;  %v8247_v36 = vld [vmem:[#allocation12_spill] sm:$0xff] }
  0x45   :  { %6312 = vmatprep.subr.mxu0 %v7385_v57  ;;  %6342 = vmatprep.subr.mxu1 %v8244_v26 }
  0x46   :  { %6313 = vmatpush3.msra.mxu0 %v7398_v32  ;;  %6343 = vmatpush3.msra.mxu1 %v8245_v20  ;;  %v8249_v32 = vld [vmem:[#allocation14_spill] sm:$0xff] }
  0x47   :  { %6314 = vmatprep.subr.mxu0 %v7410_v13  ;;  %6344 = vmatprep.subr.mxu1 %v8246_v2 }
  0x48   :  { %210 = vmatprep.mubr.f32.mxu0 %v209_v54  ;;  %6315 = vmatpush3.msra.mxu0 %v7417_v61  ;;  %v8252_v54 = vld [vmem:[#allocation18_spill] sm:$0xff] }
  0x49   :  { %6345 = vmatpush3.msra.mxu1 %v8247_v36  ;;  %216 = vmatmul.mubr.f32.gmra.mxu0 %v215_v1  ;;  %v8251_v1 = vand.u32 4294901760, %v6986_v18  ;;  %v8258_v18 = vld [vmem:[#allocation22_spill] sm:$0xff] }
  0x4a   :  { %6316 = vmatprep.subr.mxu0 %v7434_v41  ;;  %6346 = vmatprep.subr.mxu1 %v8248_v27 }
  0x4b   :  { %6317 = vmatpush3.msra.mxu0 %v7444_v43  ;;  %6347 = vmatpush3.msra.mxu1 %v8249_v32  ;;  %v8253_v32 = vand.u32 4294901760, %v7008_v23  ;;  %v8259_v23 = vand.u32 4294901760, %v7046_v35  ;;  %v8263_v35 = vand.u32 4294901760, %v7111_v59  ;;  %v8268_v59 = vand.u32 4294901760, %v7499_v49 }
  0x4c   :  { %6318 = vmatprep.subr.mxu0 %v7453_v14  ;;  %6348 = vmatprep.subr.mxu1 %v8250_v44  ;;  %v8254_v44 = vld [vmem:[#allocation19_spill] sm:$0xff] }
  0x4d   :  { %6319 = vmatpush3.msra.mxu0 %v7460_v29  ;;  %590 = vmatprep.mubr.f32.mxu0 %v7394_v30  ;;  %v8255_v29 = vand.u32 4294901760, %v7014_v25  ;;  %v8260_v25 = vand.u32 4294901760, %v7062_v40  ;;  %v8266_v40 = vand.u32 4294901760, %v7140_v8  ;;  %v8275_v8 = vand.u32 4294901760, %v7262_v34 }
  0x4e   :  { %6349 = vmatpush3.msra.mxu1 %v7234_v63  ;;  %593 = vmatmul.mubr.f32.vlgmr.msra.gmra.mxu0 %v7406_v19  ;;  %v8256_v63 = vand.u32 4294901760, %v7037_v31  ;;  %v8261_v31 = vand.u32 4294901760, %v7076_v45  ;;  %v8267_v45 = vand.u32 4294901760, %v7154_v42  ;;  %v8278_v34 = vand.u32 4294901760, %v8237_v56 }
  0x4f   :  { %6350 = vmatprep.subr.mxu1 %v7251_v39  ;;  %6364 = vmatprep.subr.mxu0 %v8251_v1  ;;  %v8257_v39 = vld [vmem:[#allocation20_spill] sm:$0xff]  ;;  %v8294_v56 = vand.u32 4294901760, %v7453_v14  ;;  %v6872_v1 = vmov 0.0  }
  0x50   :  { %6351 = vmatpush3.msra.mxu1 %v8252_v54  ;;  %6365 = vmatpush3.msra.mxu0 %v8253_v32  ;;  %v8264_v32 = vand.u32 4294901760, %v7406_v19  ;;  %v8286_v19 = vand.u32 4294901760, %v7385_v57 }
  0x51   :  { %453 = vmatprep.mubr.f32.mxu1 %v7486_v51  ;;  %6352 = vmatprep.subr.mxu1 %v8254_v44 }
  0x52   :  { %6366 = vmatprep.subr.mxu0 %v8255_v29  ;;  %455 = vmatmul.mubr.f32.gmra.mxu1 %v7492_v7  ;;  %v8265_v29 = vand.u32 4294901760, %v7126_v0  ;;  %v8271_v0 = vand.u32 4294901760, %v7183_v21  ;;  %v8281_v21 = vld [vmem:[#allocation24_spill] sm:$0xff] }
  0x53   :  { %6367 = vmatpush3.msra.mxu0 %v8256_v63  ;;  %6353 = vmatpush3.msra.mxu1 %v8257_v39  ;;  %v8262_v63 = vand.u32 4294901760, %v7394_v30  ;;  %v8269_v30 = vand.u32 4294901760, %v7166_v48  ;;  %v8280_v48 = vld [vmem:[#allocation5_spill] sm:$0xff] }
  0x54   :  { %599 = vmatprep.mubr.f32.mxu0 %v7499_v49  ;;  %6354 = vmatprep.subr.mxu1 %v8258_v18 }
  0x55   :  { %6368 = vmatprep.subr.mxu0 %v8259_v23  ;;  %602 = vmatmul.mubr.f32.gmra.mxu0 %v7506_v50 }
  0x56   :  { %6355 = vmatpush3.msra.mxu1 %v7329_v38  ;;  %6369 = vmatpush3.msra.mxu0 %v8260_v25 }
  0x57   :  { %6356 = vmatprep.subr.mxu1 %v7346_v52  ;;  %6370 = vmatprep.subr.mxu0 %v8261_v31 }
  0x58   :  { %6357 = vmatpush3.msra.mxu1 %v7368_v58  ;;  %706 = vmatprep.mubr.f32.mxu1 %v8262_v63 }
  0x59   :  { %6371 = vmatpush3.msra.mxu0 %v8263_v35  ;;  %710 = vmatmul.mubr.f32.vlgmr.msra.gmra.mxu1 %v8264_v32 }
  0x5a   :  { %6372 = vmatprep.subr.mxu0 %v8265_v29  ;;  %6402 = vmatprep.subr.mxu1 %v6948_v3  ;;  %v8270_v3 = vand.u32 4294901760, %v7506_v50  ;;  %v8290_v50 = vand.u32 4294901760, %v7417_v61  ;;  %v8295_v61 = vld [vmem:[#allocation15_spill] sm:$0xff]  ;;  %v6209_v29 = vld [vmem:[%s8121_s3] ss:$0 sm:$0xff] }
  0x5b   :  { %6373 = vmatpush3.msra.mxu0 %v8266_v40  ;;  %6403 = vmatpush3.msra.mxu1 %v6950_v4  ;;  %v8272_v4 = vand.u32 4294901760, %v7195_v6  ;;  %v8282_v6 = vand.u32 4294901760, %v8281_v21 }
  0x5c   :  { %6374 = vmatprep.subr.mxu0 %v8267_v45  ;;  %6404 = vmatprep.subr.mxu1 %v6952_v5  ;;  %v8273_v5 = vand.u32 4294901760, %v7222_v55 }
  0x5d   :  { %717 = vmatprep.mubr.f32.mxu1 %v8268_v59  ;;  %6375 = vmatpush3.msra.mxu0 %v8269_v30 }
  0x5e   :  { %6405 = vmatpush3.msra.mxu1 %v6963_v9  ;;  %6376 = vmatprep.subr.mxu0 %v8271_v0  ;;  %v8274_v9 = vand.u32 4294901760, %v7238_v28 }
  0x5f   :  { %721 = vmatmul.mubr.f32.gmra.mxu1 %v8270_v3  ;;  %6406 = vmatprep.subr.mxu1 %v6965_v10  ;;  %v87_v10 = vld [vmem:[%s8118_s11] sm:$0xf] }
  0x60   :  { %6377 = vmatpush3.msra.mxu0 %v8272_v4  ;;  %6407 = vmatpush3.msra.mxu1 %v6967_v11  ;;  %v8276_v11 = vand.u32 4294901760, %v7278_v46  ;;  %v1024_v55 = vsel %vm1022_vm0, %v87_v10, 0 }
  0x61   :  { %6378 = vmatprep.subr.mxu0 %v8273_v5  ;;  %6408 = vmatprep.subr.mxu1 %v6979_v15  ;;  %v45_v15 = vld [vmem:[%s8119_s1] sm:$0xff] }
  0x62   :  { %6379 = vmatpush3.msra.mxu0 %v8274_v9  ;;  %6409 = vmatpush3.msra.mxu1 %v6981_v16  ;;  %v8277_v16 = vand.u32 4294901760, %v7290_v60  ;;  %v1020_v42 = vsel %vm1018_vm1, %v45_v15, 0  ;;  %v8284_v60 = vld [vmem:[#allocation25_spill] sm:$0xff] }
  0x63   :  { %6380 = vmatprep.subr.mxu0 %v8275_v8  ;;  %6410 = vmatprep.subr.mxu1 %v6983_v17  ;;  %v8279_v17 = vand.u32 4294901760, %v8239_v33  ;;  %v8285_v28 = vand.u32 4294901760, %v8284_v60  ;;  %v7646_v46 = vand.u32 4294901760, %v1020_v42 }
  0x64   :  { %6381 = vmatpush3.msra.mxu0 %v8276_v11  ;;  %6411 = vmatpush3.msra.mxu1 %v7005_v22  ;;  %v8283_v22 = vand.u32 4294901760, %v7358_v53  ;;  %v8289_v53 = vand.u32 4294901760, %v7410_v13  ;;  %v8293_v13 = vld [vmem:[#allocation14_spill] sm:$0xff] }
  0x65   :  { %6382 = vmatprep.subr.mxu0 %v8277_v16  ;;  %6412 = vmatprep.subr.mxu1 %v7011_v24  ;;  %v7641_v24 = vand.u32 4294901760, %v1024_v55  ;;  %v1093_v57 = vsub.f32 %v1020_v42, %v7646_v46 }
  0x66   :  { %6383 = vmatpush3.msra.mxu0 %v8278_v34  ;;  %6413 = vmatpush3.msra.mxu1 %v8238_v47  ;;  %v8296_v47 = vld [vmem:[#allocation29_spill] sm:$0xff] }
  0x67   :  { %6384 = vmatprep.subr.mxu0 %v8279_v17  ;;  %6414 = vmatprep.subr.mxu1 %v8280_v48  ;;  %v8297_v33 = vand.u32 4294901760, %v8296_v47 }
  0x68   :  { %6385 = vmatpush3.msra.mxu0 %v8282_v6  ;;  %6415 = vmatpush3.msra.mxu1 %v8241_v12  ;;  %v8287_v12 = vld [vmem:[#allocation28_spill] sm:$0xff] }
  0x69   :  { %6386 = vmatprep.subr.mxu0 %v8283_v22  ;;  %6416 = vmatprep.subr.mxu1 %v8242_v62  ;;  %v8288_v49 = vand.u32 4294901760, %v8287_v12  ;;  %v1134_v62 = vsub.f32 %v1024_v55, %v7641_v24 }
  0x6a   :  { %6387 = vmatpush3.msra.mxu0 %v8285_v28  ;;  %6417 = vmatpush3.msra.mxu1 %v8243_v37  ;;  %v8292_v37 = vand.u32 4294901760, %v7444_v43  ;;  %v8301_v43 = vld [vmem:[#allocation17_spill] sm:$0xff] }
  0x6b   :  { %6388 = vmatprep.subr.mxu0 %v8286_v19  ;;  %6418 = vmatprep.subr.mxu1 %v8244_v26  ;;  %v8291_v26 = vand.u32 4294901760, %v7434_v41  ;;  %v8299_v41 = vld [vmem:[#allocation16_spill] sm:$0xff] }
  0x6c   :  { %6389 = vmatpush3.msra.mxu0 %v8288_v49  ;;  %6419 = vmatpush3.msra.mxu1 %v8245_v20  ;;  %v8298_v20 = vld [vmem:[#allocation26_spill] sm:$0xff] }
  0x6d   :  { %6390 = vmatprep.subr.mxu0 %v8289_v53  ;;  %6420 = vmatprep.subr.mxu1 %v8246_v2  ;;  %v1135_v2 = vand.u32 4294901760, %v1134_v62 }
  0x6e   :  { %6391 = vmatpush3.msra.mxu0 %v8290_v50  ;;  %6421 = vmatpush3.msra.mxu1 %v8247_v36  ;;  %v1094_v36 = vand.u32 4294901760, %v1093_v57 }
  0x6f   :  { %6392 = vmatprep.subr.mxu0 %v8291_v26  ;;  %6422 = vmatprep.subr.mxu1 %v8248_v27  ;;  %v8300_v27 = vld [vmem:[#allocation27_spill] sm:$0xff]  ;;  %v1136_v14 = vsub.f32 %v1134_v62, %v1135_v2 }
  0x70   :  { %6393 = vmatpush3.msra.mxu0 %v8292_v37  ;;  %6423 = vmatpush3.msra.mxu1 %v8293_v13  ;;  %v1095_v23 = vsub.f32 %v1093_v57, %v1094_v36  ;;  %v6210_v13 = vld [vmem:[%s8122_s9] ss:$0 sm:$0xff] }
  0x71   :  { %6394 = vmatprep.subr.mxu0 %v8294_v56  ;;  %6424 = vmatprep.subr.mxu1 %v8295_v61 }
  0x72   :  { %6395 = vmatpush3.msra.mxu0 %v8297_v33  ;;  %887 = vmatprep.mubr.f32.mxu0 %v8298_v20 }
  0x73   :  { %6425 = vmatpush3.msra.mxu1 %v8299_v41  ;;  %889 = vmatmul.mubr.f32.vlgmr.msra.gmra.mxu0 %v8300_v27 }
  0x74   :  { %6426 = vmatprep.subr.mxu1 %v8301_v43  ;;  %894 = vmatprep.mubr.f32.mxu0 %v7486_v51 }
  0x75   :  { %6427 = vmatpush3.msra.mxu1 %v8252_v54  ;;  %6560 = vmatprep.subr.mxu0 %v6872_v1  ;;  %v1137_v54 = vand.u32 4294901760, %v1136_v14 }
  0x76   :  { %6428 = vmatprep.subr.mxu1 %v8254_v44  ;;  %998 = vmatprep.mubr.f32.mxu1 %v8298_v20  ;;  %v1096_v44 = vand.u32 4294901760, %v1095_v23 }
  0x77   :  { %6429 = vmatpush3.msra.mxu1 %v8257_v39  ;;  %896 = vmatmul.mubr.f32.gmra.mxu0 %v7492_v7  ;;  %v82_v39 = vld [vmem:[%s8120_s6] sm:$0xff] }
  0x78   :  { %6430 = vmatprep.subr.mxu1 %v8258_v18  ;;  %6561 = vmatpush3.msra.mxu0 %v7641_v24 }
  0x79   :  { %6431 = vmatpush3.msra.mxu1 %v7329_v38  ;;  %6562 = vmatprep.mubr.msk.f32.mxu0 %vm6873_vm2, %v6872_v1 }
  0x7a   :  { %6432 = vmatprep.subr.mxu1 %v7346_v52  ;;  %6570 = vmatprep.subr.mxu0 %v6872_v1  ;;  %v7724_v52 = vand.u32 4294901760, %v82_v39 }
  0x7b   :  { %6433 = vmatpush3.msra.mxu1 %v7368_v58  ;;  %6563 = vmatmul.mubr.f32.vlgmr.msra.gmra.mxu0 %v1096_v44 }
  0x7c   :  { %1000 = vmatmul.mubr.f32.vlgmr.msra.gmra.mxu1 %v8300_v27  ;;  %6565 = vmatprep.subr.mxu1 %v6872_v1  ;;  %v7727_v38 = vsub.f32 %v82_v39, %v7724_v52  ;;  %v86_v39 = vld [vmem:[%s8123_s10] sm:$0xff] }
  0x7d   :  { %6566 = vmatpush3.msra.mxu1 %v1137_v54  ;;  %1005 = vmatprep.mubr.f32.mxu1 %v7486_v51 }
  0x7e   :  { %6575 = vmatprep.subr.mxu1 %v6872_v1  ;;  %6571 = vmatpush3.msra.mxu0 %v1134_v62  ;;  %v1591_v58 = vand.u32 4294901760, %v7727_v38 }
  0x7f   :  { %6572 = vmatprep.mubr.msk.f32.mxu0 %vm6873_vm2, %v6872_v1  ;;  %6580 = vmatprep.subr.mxu0 %v6872_v1 }
  0x80   :  { %1007 = vmatmul.mubr.f32.gmra.mxu1 %v7492_v7  ;;  %6573 = vmatmul.mubr.f32.vlgmr.msra.gmra.mxu0 %v1093_v57  ;;  %v1592_v51 = vsub.f32 %v7727_v38, %v1591_v58 }
  0x81   :  { %6567 = vmatprep.mubr.msk.f32.mxu1 %vm6873_vm2, %v6872_v1  ;;  %6581 = vmatpush3.msra.mxu0 %v1135_v2 }
  0x82   :  { %6582 = vmatprep.mubr.msk.f32.mxu0 %vm6873_vm2, %v6872_v1  ;;  %6590 = vmatprep.subr.mxu0 %v6872_v1  ;;  %v1593_v7 = vand.u32 4294901760, %v1592_v51 }
  0x84   :  { %6568 = vmatmul.mubr.f32.vlgmr.msra.gmra.mxu1 %v7646_v46  ;;  %6583 = vmatmul.mubr.f32.vlgmr.msra.gmra.mxu0 %v7646_v46 }
  0x85   :  { %6576 = vmatpush3.msra.mxu1 %v7641_v24  ;;  %6577 = vmatprep.mubr.msk.f32.mxu1 %vm6873_vm2, %v6872_v1 }
  0x86   :  { %6585 = vmatprep.subr.mxu1 %v6872_v1  ;;  %6592 = vmatprep.mubr.msk.f32.mxu0 %vm6873_vm2, %v6872_v1 }
  0x87   :  { %6591 = vmatpush3.msra.mxu0 %v7724_v52 }
  0x88   :  { %6578 = vmatmul.mubr.f32.vlgmr.msra.gmra.mxu1 %v1094_v36  ;;  %6600 = vmatprep.subr.mxu0 %v6872_v1 }
  0x89   :  { %6586 = vmatpush3.msra.mxu1 %v7641_v24  ;;  %6587 = vmatprep.mubr.msk.f32.mxu1 %vm6873_vm2, %v6872_v1 }
  0x8a   :  { %6595 = vmatprep.subr.mxu1 %v6872_v1 }
  0x8c   :  { %6588 = vmatmul.mubr.f32.vlgmr.msra.gmra.mxu1 %v7646_v46 }
  0x8d   :  { %6597 = vmatprep.mubr.msk.f32.mxu1 %vm6873_vm2, %v6872_v1  ;;  %6596 = vmatpush3.msra.mxu1 %v1593_v7 }
  0x8e   :  { %6605 = vmatprep.subr.mxu1 %v6872_v1 }
  0xec   :  { %v6244_v18 = vpop.f32.mrf.mxu0 }
  0xee   :  { %v6245_v25 = vpop.f32.mrf.mxu0 }
  0xef   :  { %v6246_v48 = vadd.f32 %v6245_v25, %v6244_v18 }
  0xf1   :  { %v203_v6 = vadd.f32 %v6246_v48, %v6209_v29 }
  0xf5   :  { %v6282_v35 = vpop.f32.mrf.mxu1 }
  0xf7   :  { %v6283_v59 = vpop.f32.mrf.mxu1 }
  0xf8   :  { %v6284_v22 = vadd.f32 %v6283_v59, %v6282_v35 }
  0xfa   :  { %v450_v46 = vadd.f32 %v6284_v22, %v203_v6 }
 0x109   :  { %v6247_v31 = vpop.f32.mrf.mxu0 }
 0x10b   :  { %v6248_v63 = vpop.f32.mrf.mxu0 }
 0x10c   :  { %v6249_v32 = vadd.f32 %v6248_v63, %v6247_v31 }
 0x10e   :  { %v218_v40 = vadd.f32 %v6249_v32, %v6209_v29  ;;  %v6320_v45 = vpop.f32.mrf.mxu0  ;;  %v7749_v32 = vand.u32 4294901760, %v86_v39 }
 0x110   :  { %v6321_v30 = vpop.f32.mrf.mxu0 }
 0x111   :  { %v6322_v60 = vadd.f32 %v6321_v30, %v6320_v45 }
 0x112   :  { %v6285_v3 = vpop.f32.mrf.mxu1 }
 0x113   :  { %v595_v49 = vadd.f32 %v6322_v60, %v450_v46 }
 0x114   :  { %v6286_v0 = vpop.f32.mrf.mxu1 }
 0x115   :  { %v6287_v4 = vadd.f32 %v6286_v0, %v6285_v3  ;;  %v6323_v5 = vpop.f32.mrf.mxu0  ;;  %v7755_v3 = vsub.f32 %v86_v39, %v7749_v32 }
 0x117   :  { %v457_v9 = vadd.f32 %v6287_v4, %v218_v40  ;;  %v6324_v8 = vpop.f32.mrf.mxu0 }
 0x118   :  { %v6325_v10 = vadd.f32 %v6324_v8, %v6323_v5  ;;  %v7762_v8 = vand.u32 4294901760, %v7755_v3 }
 0x119   :  { %v6358_v11 = vpop.f32.mrf.mxu1 }
 0x11a   :  { %v604_v15 = vadd.f32 %v6325_v10, %v457_v9 }
 0x11b   :  { %v6359_v16 = vpop.f32.mrf.mxu1 }
 0x11c   :  { %v6360_v19 = vadd.f32 %v6359_v16, %v6358_v11  ;;  %v84_v11 = vld [vmem:[%s8124_s8] sm:$0xff] }
 0x11e   :  { %v712_v57 = vadd.f32 %v6360_v19, %v595_v49 }
 0x11f   :  { %v6361_v34 = vpop.f32.mrf.mxu1 }
 0x121   :  { %v6362_v55 = vpop.f32.mrf.mxu1 }
 0x122   :  { %v6363_v17 = vadd.f32 %v6362_v55, %v6361_v34  ;;  %v2043_v55 = vsub.f32 %v7755_v3, %v7762_v8 }
 0x124   :  { %v723_v42 = vadd.f32 %v6363_v17, %v604_v15  ;;  %v7776_v17 = vand.u32 4294901760, %v84_v11  ;;  %v7785_v6 = vand.u32 4294901760, %v2043_v55 }
 0x126   :  { %v7788_v22 = vsub.f32 %v84_v11, %v7776_v17 }
 0x133   :  { %v6396_v21 = vpop.f32.mrf.mxu0 }
 0x135   :  { %v6397_v24 = vpop.f32.mrf.mxu0 }
 0x136   :  { %v6398_v53 = vadd.f32 %v6397_v24, %v6396_v21  ;;  %v7800_v24 = vand.u32 4294901760, %v7788_v22 }
 0x137   :  { %v6399_v28 = vpop.f32.mrf.mxu0 }
 0x138   :  { %v891_v2 = vadd.f32 %v6398_v53, %v712_v57  ;;  %v6211_v53 = vld [vmem:[%s8125_s7] ss:$0 sm:$0xff] }
 0x139   :  { %v6400_v12 = vpop.f32.mrf.mxu0 }
 0x13a   :  { %v6401_v62 = vadd.f32 %v6400_v12, %v6399_v28  ;;  %v2490_v28 = vsub.f32 %v7788_v22, %v7800_v24 }
 0x13b   :  { %v1098_v56 = vpop.f32.mrf.mxu0 }
 0x13c   :  { %v6434_v50 = vpop.f32.mrf.mxu1  ;;  %v898_v26 = vadd.f32 %v6401_v62, %v723_v42  ;;  %v1099_v20 = vadd.f32 %v6210_v13, %v1098_v56 }
 0x13d   :  { %v6564_v33 = vpop.f32.mrf.mxu0 }
 0x13e   :  { %v6435_v37 = vpop.f32.mrf.mxu1 }
 0x13f   :  { %v6436_v61 = vadd.f32 %v6435_v37, %v6434_v50 }
 0x140   :  { %v6437_v47 = vpop.f32.mrf.mxu1  ;;  %v1248_v27 = vpop.f32.mrf.mxu0 }
 0x141   :  { %v1002_v36 = vadd.f32 %v6436_v61, %v891_v2 }
 0x142   :  { %v6438_v41 = vpop.f32.mrf.mxu1  ;;  %v6574_v23 = vpop.f32.mrf.mxu0 }
 0x143   :  { %1929 = vst.msk [vmem:[#allocation2] sm:$0x3] %vm1928_vm3, %v1002_v36  ;;  %v6439_v43 = vadd.f32 %v6438_v41, %v6437_v47  ;;  %v6177_v18 = vrot.slane %v1002_v36, 2  ;;  %v1931_v10 = vsel %vm1478_vm5, %v1002_v36, 0 }
 0x144   :  { %v1174_v14 = vpop.f32.mrf.mxu1  ;;  %v1396_v7 = vpop.f32.mrf.mxu0  ;;  %v7771_v16 = vand.u32 4294901760, %v1931_v10 }
 0x145   :  { %v7743_v54 = vadd.f32 %v6439_v43, %v898_v26  ;;  %v1175_v44 = vadd.f32 %v1174_v14, %v1099_v20 }
 0x146   :  { %v6569_v51 = vpop.f32.mrf.mxu1  ;;  %v6584_v35 = vpop.f32.mrf.mxu0  ;;  %v7782_v48 = vsub.f32 %v1931_v10, %v7771_v16 }
 0x147   :  { %v6178_v25 = vrot.slane %v7743_v54, 2  ;;  %v1249_v31 = vadd.f32 %v1248_v27, %v1175_v44 }
 0x148   :  { %v1322_v63 = vpop.f32.mrf.mxu1 }
 0x149   :  { %v1323_v29 = vadd.f32 %v1322_v63, %v1249_v31  ;;  %v7752_v40 = vsel %vm6156_vm4, %v6177_v18, %v6178_v25 }
 0x14a   :  { %v6579_v45 = vpop.f32.mrf.mxu1 }
 0x14b   :  { %v1397_v59 = vadd.f32 %v1396_v7, %v1323_v29 }
 0x14c   :  { %v1468_v30 = vpop.f32.mrf.mxu1 }
 0x14d   :  { %v7757_v0 = vadd.f32 %v1468_v30, %v1397_v59 }
 0x14e   :  { %v6589_v4 = vpop.f32.mrf.mxu1 }
 0x14f   :  { %v1480_v5 = vsel %vm1478_vm5, %v7757_v0, 0 }
 0x150   :  { %v1548_v9 = vand.u32 4294901760, %v1480_v5 }
 0x152   :  { %v1549_v15 = vsub.f32 %v1480_v5, %v1548_v9  ;;  %6598 = vmatmul.mubr.f32.vlgmr.msra.gmra.mxu1 %v1548_v9 }
 0x153   :  { %6606 = vmatpush3.msra.mxu1 %v7724_v52  ;;  %6607 = vmatprep.mubr.msk.f32.mxu1 %vm6873_vm2, %v6872_v1 }
 0x154   :  { %v1550_v34 = vand.u32 4294901760, %v1549_v15  ;;  %6615 = vmatprep.subr.mxu1 %v6872_v1 }
 0x156   :  { %6608 = vmatmul.mubr.f32.vlgmr.msra.gmra.mxu1 %v1550_v34  ;;  %v1551_v42 = vsub.f32 %v1549_v15, %v1550_v34 }
 0x157   :  { %6616 = vmatpush3.msra.mxu1 %v7724_v52  ;;  %6617 = vmatprep.mubr.msk.f32.mxu1 %vm6873_vm2, %v6872_v1  ;;  %v7797_v52 = vand.u32 4294901760, %v7782_v48 }
 0x158   :  { %v1552_v21 = vand.u32 4294901760, %v1551_v42  ;;  %6625 = vmatprep.subr.mxu1 %v6872_v1 }
 0x159   :  { %v2002_v60 = vsub.f32 %v7782_v48, %v7797_v52 }
 0x15a   :  { %6593 = vmatmul.mubr.f32.vlgmr.msra.gmra.mxu0 %v1552_v21  ;;  %6618 = vmatmul.mubr.f32.vlgmr.msra.gmra.mxu1 %v1548_v9 }
 0x15b   :  { %6601 = vmatpush3.msra.mxu0 %v7727_v38  ;;  %6602 = vmatprep.mubr.msk.f32.mxu0 %vm6873_vm2, %v6872_v1  ;;  %v7825_v38 = vand.u32 4294901760, %v2002_v60 }
 0x15c   :  { %6626 = vmatpush3.msra.mxu1 %v7785_v6  ;;  %6627 = vmatprep.mubr.msk.f32.mxu1 %vm6873_vm2, %v6872_v1 }
 0x15d   :  { %6610 = vmatprep.subr.mxu0 %v6872_v1  ;;  %6635 = vmatprep.subr.mxu1 %v6872_v1 }
 0x15e   :  { %6603 = vmatmul.mubr.f32.vlgmr.msra.gmra.mxu0 %v1549_v15  ;;  %6628 = vmatmul.mubr.f32.vlgmr.msra.gmra.mxu1 %v7771_v16 }
 0x15f   :  { %6611 = vmatpush3.msra.mxu0 %v1591_v58  ;;  %6612 = vmatprep.mubr.msk.f32.mxu0 %vm6873_vm2, %v6872_v1  ;;  %v7827_v58 = vand.u32 4294901760, %v2490_v28 }
 0x160   :  { %6636 = vmatpush3.msra.mxu1 %v7749_v32  ;;  %6637 = vmatprep.mubr.msk.f32.mxu1 %vm6873_vm2, %v6872_v1 }
 0x161   :  { %6620 = vmatprep.subr.mxu0 %v6872_v1  ;;  %6645 = vmatprep.subr.mxu1 %v6872_v1 }
 0x162   :  { %6613 = vmatmul.mubr.f32.vlgmr.msra.gmra.mxu0 %v1548_v9  ;;  %6638 = vmatmul.mubr.f32.vlgmr.msra.gmra.mxu1 %v7797_v52 }
 0x163   :  { %6621 = vmatpush3.msra.mxu0 %v7749_v32  ;;  %6622 = vmatprep.mubr.msk.f32.mxu0 %vm6873_vm2, %v6872_v1 }
 0x164   :  { %6646 = vmatpush3.msra.mxu1 %v7749_v32  ;;  %6647 = vmatprep.mubr.msk.f32.mxu1 %vm6873_vm2, %v6872_v1 }
 0x165   :  { %6630 = vmatprep.subr.mxu0 %v6872_v1  ;;  %6655 = vmatprep.subr.mxu1 %v6872_v1 }
 0x166   :  { %6623 = vmatmul.mubr.f32.vlgmr.msra.gmra.mxu0 %v7825_v38  ;;  %6648 = vmatmul.mubr.f32.vlgmr.msra.gmra.mxu1 %v7771_v16 }
 0x167   :  { %6631 = vmatpush3.msra.mxu0 %v7755_v3  ;;  %6632 = vmatprep.mubr.msk.f32.mxu0 %vm6873_vm2, %v6872_v1 }
 0x168   :  { %6656 = vmatpush3.msra.mxu1 %v7827_v58  ;;  %6657 = vmatprep.mubr.msk.f32.mxu1 %vm6873_vm2, %v6872_v1 }
 0x169   :  { %6640 = vmatprep.subr.mxu0 %v6872_v1  ;;  %6665 = vmatprep.subr.mxu1 %v6872_v1 }
 0x16a   :  { %6633 = vmatmul.mubr.f32.vlgmr.msra.gmra.mxu0 %v7782_v48  ;;  %6658 = vmatmul.mubr.f32.vlgmr.msra.gmra.mxu1 %v7771_v16 }
 0x16b   :  { %6641 = vmatpush3.msra.mxu0 %v7762_v8  ;;  %6642 = vmatprep.mubr.msk.f32.mxu0 %vm6873_vm2, %v6872_v1 }
 0x16c   :  { %6666 = vmatpush3.msra.mxu1 %v7776_v17  ;;  %6667 = vmatprep.mubr.msk.f32.mxu1 %vm6873_vm2, %v6872_v1 }
 0x16d   :  { %6650 = vmatprep.subr.mxu0 %v6872_v1  ;;  %6675 = vmatprep.subr.mxu1 %v6872_v1 }
 0x16e   :  { %6643 = vmatmul.mubr.f32.vlgmr.msra.gmra.mxu0 %v7771_v16  ;;  %6668 = vmatmul.mubr.f32.vlgmr.msra.gmra.mxu1 %v7797_v52 }
 0x16f   :  { %6651 = vmatpush3.msra.mxu0 %v7776_v17  ;;  %6652 = vmatprep.mubr.msk.f32.mxu0 %vm6873_vm2, %v6872_v1 }
 0x170   :  { %6676 = vmatpush3.msra.mxu1 %v7776_v17  ;;  %6677 = vmatprep.mubr.msk.f32.mxu1 %vm6873_vm2, %v6872_v1 }
 0x171   :  { %6660 = vmatprep.subr.mxu0 %v6872_v1  ;;  %6685 = vmatprep.subr.mxu1 %v6872_v1 }
 0x172   :  { %6653 = vmatmul.mubr.f32.vlgmr.msra.gmra.mxu0 %v7825_v38  ;;  %6678 = vmatmul.mubr.f32.vlgmr.msra.gmra.mxu1 %v7771_v16 }
 0x173   :  { %6661 = vmatpush3.msra.mxu0 %v7788_v22  ;;  %6662 = vmatprep.mubr.msk.f32.mxu0 %vm6873_vm2, %v6872_v1 }
 0x174   :  { %6670 = vmatprep.subr.mxu0 %v6872_v1  ;;  %6686 = vmatpush3.msra.mxu1 %v7785_v6 }
 0x175   :  { %6687 = vmatprep.mubr.msk.f32.mxu1 %vm6873_vm2, %v6872_v1  ;;  %6695 = vmatprep.subr.mxu1 %v6872_v1 }
 0x176   :  { %6663 = vmatmul.mubr.f32.vlgmr.msra.gmra.mxu0 %v7782_v48 }
 0x177   :  { %6671 = vmatpush3.msra.mxu0 %v7800_v24  ;;  %6672 = vmatprep.mubr.msk.f32.mxu0 %vm6873_vm2, %v6872_v1 }
 0x178   :  { %6680 = vmatprep.subr.mxu0 %v6872_v1 }
 0x17a   :  { %6673 = vmatmul.mubr.f32.vlgmr.msra.gmra.mxu0 %v7771_v16 }
 0x17b   :  { %6681 = vmatpush3.msra.mxu0 %v7749_v32  ;;  %6682 = vmatprep.mubr.msk.f32.mxu0 %vm6873_vm2, %v6872_v1 }
 0x17c   :  { %6690 = vmatprep.subr.mxu0 %v6872_v1 }
 0x212   :  { %v1630_v46 = vpop.f32.mrf.mxu1 }
 0x214   :  { %v6599_v19 = vpop.f32.mrf.mxu1 }
 0x216   :  { %v1778_v12 = vpop.f32.mrf.mxu1 }
 0x218   :  { %v6609_v49 = vpop.f32.mrf.mxu1 }
 0x21a   :  { %v1554_v62 = vpop.f32.mrf.mxu0  ;;  %v1924_v50 = vpop.f32.mrf.mxu1 }
 0x21b   :  { %v1555_v37 = vadd.f32 %v6211_v53, %v1554_v62 }
 0x21c   :  { %v6594_v57 = vpop.f32.mrf.mxu0  ;;  %v6619_v26 = vpop.f32.mrf.mxu1 }
 0x21d   :  { %v1631_v47 = vadd.f32 %v1630_v46, %v1555_v37 }
 0x21e   :  { %v1704_v13 = vpop.f32.mrf.mxu0  ;;  %v2081_v56 = vpop.f32.mrf.mxu1 }
 0x21f   :  { %v1705_v27 = vadd.f32 %v1704_v13, %v1631_v47 }
 0x220   :  { %v6604_v2 = vpop.f32.mrf.mxu0  ;;  %v6629_v61 = vpop.f32.mrf.mxu1 }
 0x221   :  { %v1779_v51 = vadd.f32 %v1778_v12, %v1705_v27 }
 0x222   :  { %v1852_v33 = vpop.f32.mrf.mxu0  ;;  %v2229_v36 = vpop.f32.mrf.mxu1 }
 0x223   :  { %v1853_v29 = vadd.f32 %v1852_v33, %v1779_v51 }
 0x224   :  { %v6614_v20 = vpop.f32.mrf.mxu0  ;;  %v6639_v41 = vpop.f32.mrf.mxu1 }
 0x225   :  { %v7885_v10 = vadd.f32 %v1924_v50, %v1853_v29 }
 0x226   :  { %v2005_v43 = vpop.f32.mrf.mxu0  ;;  %v2375_v14 = vpop.f32.mrf.mxu1 }
 0x227   :  { %v2006_v23 = vadd.f32 %v2005_v43, %v7757_v0 }
 0x228   :  { %v6624_v44 = vpop.f32.mrf.mxu0  ;;  %v6649_v39 = vpop.f32.mrf.mxu1 }
 0x229   :  { %v2082_v7 = vadd.f32 %v2081_v56, %v2006_v23  ;;  %v2827_v44 = vrot.slane %v7757_v0, 2 }
 0x22a   :  { %v2155_v18 = vpop.f32.mrf.mxu0  ;;  %v2528_v25 = vpop.f32.mrf.mxu1 }
 0x22b   :  { %v2156_v31 = vadd.f32 %v2155_v18, %v2082_v7 }
 0x22c   :  { %v6634_v63 = vpop.f32.mrf.mxu0  ;;  %v6659_v35 = vpop.f32.mrf.mxu1 }
 0x22d   :  { %v2230_v45 = vadd.f32 %v2229_v36, %v2156_v31 }
 0x22e   :  { %v2303_v59 = vpop.f32.mrf.mxu0  ;;  %v2676_v30 = vpop.f32.mrf.mxu1 }
 0x22f   :  { %v2304_v4 = vadd.f32 %v2303_v59, %v2230_v45 }
 0x230   :  { %v6644_v5 = vpop.f32.mrf.mxu0  ;;  %v6669_v9 = vpop.f32.mrf.mxu1 }
 0x231   :  { %v2376_v11 = vadd.f32 %v2375_v14, %v2304_v4 }
 0x232   :  { %v2452_v15 = vpop.f32.mrf.mxu0  ;;  %v2822_v34 = vpop.f32.mrf.mxu1 }
 0x233   :  { %2379 = vst.msk [vmem:[#allocation3] sm:$0x3] %vm1928_vm3, %v2376_v11  ;;  %v2830_v55 = vsel %vm1478_vm5, %v2376_v11, 0  ;;  %v2453_v42 = vadd.f32 %v2452_v15, %v7885_v10 }
 0x234   :  { %v2898_v21 = vand.u32 4294901760, %v2830_v55  ;;  %v6654_v60 = vpop.f32.mrf.mxu0  ;;  %v6679_v28 = vpop.f32.mrf.mxu1 }
 0x235   :  { %v2529_v46 = vadd.f32 %v2528_v25, %v2453_v42 }
 0x236   :  { %v2899_v19 = vsub.f32 %v2830_v55, %v2898_v21  ;;  %v2602_v12 = vpop.f32.mrf.mxu0  ;;  %6688 = vmatmul.mubr.f32.vlgmr.msra.gmra.mxu1 %v2898_v21  ;;  %v3280_v55 = vrot.slane %v7885_v10, 2 }
 0x237   :  { %v2603_v49 = vadd.f32 %v2602_v12, %v2529_v46  ;;  %6696 = vmatpush3.msra.mxu1 %v7749_v32  ;;  %6697 = vmatprep.mubr.msk.f32.mxu1 %vm6873_vm2, %v6872_v1 }
 0x238   :  { %v6664_v53 = vpop.f32.mrf.mxu0  ;;  %v2900_v62 = vand.u32 4294901760, %v2899_v19  ;;  %6705 = vmatprep.subr.mxu1 %v6872_v1 }
 0x239   :  { %v2677_v50 = vadd.f32 %v2676_v30, %v2603_v49 }
 0x23a   :  { %v2750_v57 = vpop.f32.mrf.mxu0  ;;  %6698 = vmatmul.mubr.f32.vlgmr.msra.gmra.mxu1 %v2900_v62  ;;  %v2901_v26 = vsub.f32 %v2899_v19, %v2900_v62 }
 0x23b   :  { %v2751_v37 = vadd.f32 %v2750_v57, %v2677_v50  ;;  %6706 = vmatpush3.msra.mxu1 %v7749_v32  ;;  %6707 = vmatprep.mubr.msk.f32.mxu1 %vm6873_vm2, %v6872_v1 }
 0x23c   :  { %v6674_v13 = vpop.f32.mrf.mxu0  ;;  %v2902_v56 = vand.u32 4294901760, %v2901_v26  ;;  %6715 = vmatprep.subr.mxu1 %v6872_v1 }
 0x23d   :  { %v2823_v2 = vadd.f32 %v2822_v34, %v2751_v37 }
 0x23e   :  { %6683 = vmatmul.mubr.f32.vlgmr.msra.gmra.mxu0 %v2902_v56  ;;  %6708 = vmatmul.mubr.f32.vlgmr.msra.gmra.mxu1 %v2898_v21 }
 0x23f   :  { %2826 = vst.msk [vmem:[#allocation2 + $0x2] sm:$0x3] %vm1928_vm3, %v2823_v2  ;;  %v3283_v61 = vsel %vm1478_vm5, %v2823_v2, 0  ;;  %6691 = vmatpush3.msra.mxu0 %v7755_v3  ;;  %6692 = vmatprep.mubr.msk.f32.mxu0 %vm6873_vm2, %v6872_v1 }
 0x240   :  { %v3351_v47 = vand.u32 4294901760, %v3283_v61  ;;  %6716 = vmatpush3.msra.mxu1 %v7827_v58  ;;  %6717 = vmatprep.mubr.msk.f32.mxu1 %vm6873_vm2, %v6872_v1 }
 0x241   :  { %6700 = vmatprep.subr.mxu0 %v6872_v1  ;;  %6725 = vmatprep.subr.mxu1 %v6872_v1 }
 0x242   :  { %v3352_v33 = vsub.f32 %v3283_v61, %v3351_v47  ;;  %6693 = vmatmul.mubr.f32.vlgmr.msra.gmra.mxu0 %v2899_v19  ;;  %6718 = vmatmul.mubr.f32.vlgmr.msra.gmra.mxu1 %v3351_v47 }
 0x243   :  { %6701 = vmatpush3.msra.mxu0 %v7762_v8  ;;  %6702 = vmatprep.mubr.msk.f32.mxu0 %vm6873_vm2, %v6872_v1 }
 0x244   :  { %6726 = vmatpush3.msra.mxu1 %v7776_v17  ;;  %6727 = vmatprep.mubr.msk.f32.mxu1 %vm6873_vm2, %v6872_v1  ;;  %v3353_v36 = vand.u32 4294901760, %v3352_v33 }
 0x245   :  { %6710 = vmatprep.subr.mxu0 %v6872_v1  ;;  %6735 = vmatprep.subr.mxu1 %v6872_v1 }
 0x246   :  { %6703 = vmatmul.mubr.f32.vlgmr.msra.gmra.mxu0 %v2898_v21  ;;  %6728 = vmatmul.mubr.f32.vlgmr.msra.gmra.mxu1 %v3353_v36  ;;  %v3354_v20 = vsub.f32 %v3352_v33, %v3353_v36 }
 0x247   :  { %6711 = vmatpush3.msra.mxu0 %v7776_v17  ;;  %6712 = vmatprep.mubr.msk.f32.mxu0 %vm6873_vm2, %v6872_v1 }
 0x248   :  { %6736 = vmatpush3.msra.mxu1 %v7776_v17  ;;  %6737 = vmatprep.mubr.msk.f32.mxu1 %vm6873_vm2, %v6872_v1  ;;  %v3355_v41 = vand.u32 4294901760, %v3354_v20 }
 0x249   :  { %6720 = vmatprep.subr.mxu0 %v6872_v1  ;;  %6745 = vmatprep.subr.mxu1 %v6872_v1 }
 0x24a   :  { %6713 = vmatmul.mubr.f32.vlgmr.msra.gmra.mxu0 %v3355_v41  ;;  %6738 = vmatmul.mubr.f32.vlgmr.msra.gmra.mxu1 %v3351_v47 }
 0x24b   :  { %6721 = vmatpush3.msra.mxu0 %v7788_v22  ;;  %6722 = vmatprep.mubr.msk.f32.mxu0 %vm6873_vm2, %v6872_v1 }
 0x24c   :  { %6730 = vmatprep.subr.mxu0 %v6872_v1  ;;  %6746 = vmatpush3.msra.mxu1 %v7785_v6 }
 0x24d   :  { %6747 = vmatprep.mubr.msk.f32.mxu1 %vm6873_vm2, %v6872_v1  ;;  %6755 = vmatprep.subr.mxu1 %v6872_v1 }
 0x24e   :  { %6723 = vmatmul.mubr.f32.vlgmr.msra.gmra.mxu0 %v3352_v33 }
 0x24f   :  { %6731 = vmatpush3.msra.mxu0 %v7800_v24  ;;  %6732 = vmatprep.mubr.msk.f32.mxu0 %vm6873_vm2, %v6872_v1 }
 0x250   :  { %6740 = vmatprep.subr.mxu0 %v6872_v1 }
 0x252   :  { %6733 = vmatmul.mubr.f32.vlgmr.msra.gmra.mxu0 %v3351_v47 }
 0x253   :  { %6741 = vmatpush3.msra.mxu0 %v7749_v32  ;;  %6742 = vmatprep.mubr.msk.f32.mxu0 %vm6873_vm2, %v6872_v1 }
 0x254   :  { %6750 = vmatprep.subr.mxu0 %v6872_v1 }
 0x2f6   :  { %v2980_v27 = vpop.f32.mrf.mxu1 }
 0x2f8   :  { %v6689_v43 = vpop.f32.mrf.mxu1 }
 0x2fa   :  { %v3128_v14 = vpop.f32.mrf.mxu1 }
 0x2fc   :  { %v6699_v23 = vpop.f32.mrf.mxu1 }
 0x2fe   :  { %v2904_v39 = vpop.f32.mrf.mxu0  ;;  %v3274_v51 = vpop.f32.mrf.mxu1 }
 0x2ff   :  { %v2905_v7 = vadd.f32 %v2904_v39, %v2827_v44  ;;  %v3732_v44 = vrot.slane %v7757_v0, 4 }
 0x300   :  { %v6684_v18 = vpop.f32.mrf.mxu0  ;;  %v6709_v25 = vpop.f32.mrf.mxu1 }
 0x301   :  { %v2981_v31 = vadd.f32 %v2980_v27, %v2905_v7 }
 0x302   :  { %v3054_v63 = vpop.f32.mrf.mxu0  ;;  %v3433_v35 = vpop.f32.mrf.mxu1 }
 0x303   :  { %v3055_v29 = vadd.f32 %v3054_v63, %v2981_v31 }
 0x304   :  { %v6694_v45 = vpop.f32.mrf.mxu0  ;;  %v6719_v59 = vpop.f32.mrf.mxu1 }
 0x305   :  { %v3129_v30 = vadd.f32 %v3128_v14, %v3055_v29 }
 0x306   :  { %v3202_v4 = vpop.f32.mrf.mxu0  ;;  %v3581_v5 = vpop.f32.mrf.mxu1 }
 0x307   :  { %v3203_v9 = vadd.f32 %v3202_v4, %v3129_v30 }
 0x308   :  { %v6704_v11 = vpop.f32.mrf.mxu0  ;;  %v6729_v15 = vpop.f32.mrf.mxu1 }
 0x309   :  { %v3275_v34 = vadd.f32 %v3274_v51, %v3203_v9 }
 0x30a   :  { %v3357_v42 = vpop.f32.mrf.mxu0  ;;  %v3727_v21 = vpop.f32.mrf.mxu1 }
 0x30b   :  { %3278 = vst.msk [vmem:[#allocation3 + $0x2] sm:$0x3] %vm1928_vm3, %v3275_v34  ;;  %v3735_v60 = vsel %vm1478_vm5, %v3275_v34, 0  ;;  %v3358_v28 = vadd.f32 %v3357_v42, %v3280_v55  ;;  %v4184_v34 = vrot.slane %v7885_v10, 4 }
 0x30c   :  { %v3803_v46 = vand.u32 4294901760, %v3735_v60  ;;  %v6714_v19 = vpop.f32.mrf.mxu0  ;;  %v6739_v12 = vpop.f32.mrf.mxu1 }
 0x30d   :  { %v3434_v49 = vadd.f32 %v3433_v35, %v3358_v28 }
 0x30e   :  { %v3804_v53 = vsub.f32 %v3735_v60, %v3803_v46  ;;  %v3507_v62 = vpop.f32.mrf.mxu0  ;;  %6748 = vmatmul.mubr.f32.vlgmr.msra.gmra.mxu1 %v3803_v46 }
 0x30f   :  { %v3508_v50 = vadd.f32 %v3507_v62, %v3434_v49  ;;  %6756 = vmatpush3.msra.mxu1 %v7749_v32  ;;  %6757 = vmatprep.mubr.msk.f32.mxu1 %vm6873_vm2, %v6872_v1 }
 0x310   :  { %v6724_v57 = vpop.f32.mrf.mxu0  ;;  %v3805_v26 = vand.u32 4294901760, %v3804_v53  ;;  %6765 = vmatprep.subr.mxu1 %v6872_v1 }
 0x311   :  { %v3582_v37 = vadd.f32 %v3581_v5, %v3508_v50 }
 0x312   :  { %v3655_v13 = vpop.f32.mrf.mxu0  ;;  %6758 = vmatmul.mubr.f32.vlgmr.msra.gmra.mxu1 %v3805_v26  ;;  %v3806_v56 = vsub.f32 %v3804_v53, %v3805_v26  ;;  %v80_v26 = vld [vmem:[%s8126_s4 + $0x8] sm:$0xff] }
 0x313   :  { %v3656_v2 = vadd.f32 %v3655_v13, %v3582_v37  ;;  %6766 = vmatpush3.msra.mxu1 %v7749_v32  ;;  %6767 = vmatprep.mubr.msk.f32.mxu1 %vm6873_vm2, %v6872_v1 }
 0x314   :  { %v6734_v61 = vpop.f32.mrf.mxu0  ;;  %v3807_v47 = vand.u32 4294901760, %v3806_v56  ;;  %6775 = vmatprep.subr.mxu1 %v6872_v1 }
 0x315   :  { %v3728_v33 = vadd.f32 %v3727_v21, %v3656_v2 }
 0x316   :  { %6743 = vmatmul.mubr.f32.vlgmr.msra.gmra.mxu0 %v3807_v47  ;;  %6768 = vmatmul.mubr.f32.vlgmr.msra.gmra.mxu1 %v3803_v46  ;;  %v5589_v47 = vand.u32 4294901760, %v80_v26 }
 0x317   :  { %3731 = vst.msk [vmem:[#allocation2 + $0x4] sm:$0x3] %vm1928_vm3, %v3728_v33  ;;  %v4187_v36 = vsel %vm1478_vm5, %v3728_v33, 0  ;;  %6751 = vmatpush3.msra.mxu0 %v7755_v3  ;;  %6752 = vmatprep.mubr.msk.f32.mxu0 %vm6873_vm2, %v6872_v1 }
 0x318   :  { %v4255_v20 = vand.u32 4294901760, %v4187_v36  ;;  %6776 = vmatpush3.msra.mxu1 %v7827_v58  ;;  %6777 = vmatprep.mubr.msk.f32.mxu1 %vm6873_vm2, %v6872_v1 }
 0x319   :  { %6760 = vmatprep.subr.mxu0 %v6872_v1  ;;  %6785 = vmatprep.subr.mxu1 %v6872_v1 }
 0x31a   :  { %v4256_v41 = vsub.f32 %v4187_v36, %v4255_v20  ;;  %6753 = vmatmul.mubr.f32.vlgmr.msra.gmra.mxu0 %v3804_v53  ;;  %6778 = vmatmul.mubr.f32.vlgmr.msra.gmra.mxu1 %v4255_v20  ;;  %v79_v36 = vld [vmem:[%s8126_s4] sm:$0xff] }
 0x31b   :  { %6761 = vmatpush3.msra.mxu0 %v7762_v8  ;;  %6762 = vmatprep.mubr.msk.f32.mxu0 %vm6873_vm2, %v6872_v1 }
 0x31c   :  { %6786 = vmatpush3.msra.mxu1 %v7776_v17  ;;  %6787 = vmatprep.mubr.msk.f32.mxu1 %vm6873_vm2, %v6872_v1  ;;  %v4257_v58 = vand.u32 4294901760, %v4256_v41 }
 0x31d   :  { %6770 = vmatprep.subr.mxu0 %v6872_v1  ;;  %6795 = vmatprep.subr.mxu1 %v6872_v1 }
 0x31e   :  { %6763 = vmatmul.mubr.f32.vlgmr.msra.gmra.mxu0 %v3803_v46  ;;  %6788 = vmatmul.mubr.f32.vlgmr.msra.gmra.mxu1 %v4257_v58  ;;  %v4258_v27 = vsub.f32 %v4256_v41, %v4257_v58 }
 0x31f   :  { %6771 = vmatpush3.msra.mxu0 %v7776_v17  ;;  %6772 = vmatprep.mubr.msk.f32.mxu0 %vm6873_vm2, %v6872_v1 }
 0x320   :  { %6796 = vmatpush3.msra.mxu1 %v7776_v17  ;;  %6797 = vmatprep.mubr.msk.f32.mxu1 %vm6873_vm2, %v6872_v1  ;;  %v4259_v43 = vand.u32 4294901760, %v4258_v27 }
 0x321   :  { %6780 = vmatprep.subr.mxu0 %v6872_v1  ;;  %6805 = vmatprep.subr.mxu1 %v6872_v1 }
 0x322   :  { %6773 = vmatmul.mubr.f32.vlgmr.msra.gmra.mxu0 %v4259_v43  ;;  %6798 = vmatmul.mubr.f32.vlgmr.msra.gmra.mxu1 %v4255_v20 }
 0x323   :  { %6781 = vmatpush3.msra.mxu0 %v7788_v22  ;;  %6782 = vmatprep.mubr.msk.f32.mxu0 %vm6873_vm2, %v6872_v1 }
 0x324   :  { %6790 = vmatprep.subr.mxu0 %v6872_v1  ;;  %6806 = vmatpush3.msra.mxu1 %v7785_v6 }
 0x325   :  { %6807 = vmatprep.mubr.msk.f32.mxu1 %vm6873_vm2, %v6872_v1  ;;  %6815 = vmatprep.subr.mxu1 %v6872_v1 }
 0x326   :  { %6783 = vmatmul.mubr.f32.vlgmr.msra.gmra.mxu0 %v4256_v41  ;;  %v5690_v41 = vsub.f32 %v80_v26, %v5589_v47 }
 0x327   :  { %6791 = vmatpush3.msra.mxu0 %v7800_v24  ;;  %6792 = vmatprep.mubr.msk.f32.mxu0 %vm6873_vm2, %v6872_v1 }
 0x328   :  { %6800 = vmatprep.subr.mxu0 %v6872_v1  ;;  %v5691_v58 = vand.u32 4294901760, %v5690_v41 }
 0x32a   :  { %6793 = vmatmul.mubr.f32.vlgmr.msra.gmra.mxu0 %v4255_v20  ;;  %v8018_v20 = vand.u32 4294901760, %v79_v36 }
 0x32b   :  { %6801 = vmatpush3.msra.mxu0 %v7749_v32  ;;  %6802 = vmatprep.mubr.msk.f32.mxu0 %vm6873_vm2, %v6872_v1 }
 0x32c   :  { %6810 = vmatprep.subr.mxu0 %v6872_v1  ;;  %v8028_v27 = vsub.f32 %v79_v36, %v8018_v20 }
 0x3ce   :  { %v3885_v17 = vpop.f32.mrf.mxu1 }
 0x3d0   :  { %v6749_v22 = vpop.f32.mrf.mxu1 }
 0x3d1   :  { %v5692_v22 = vsub.f32 %v5690_v41, %v5691_v58 }
 0x3d2   :  { %v4033_v14 = vpop.f32.mrf.mxu1 }
 0x3d4   :  { %v6759_v23 = vpop.f32.mrf.mxu1 }
 0x3d6   :  { %v3809_v24 = vpop.f32.mrf.mxu0  ;;  %v4179_v39 = vpop.f32.mrf.mxu1 }
 0x3d7   :  { %v3810_v51 = vadd.f32 %v3809_v24, %v3732_v44  ;;  %v5693_v24 = vand.u32 4294901760, %v5692_v22 }
 0x3d8   :  { %v6744_v7 = vpop.f32.mrf.mxu0  ;;  %v6769_v18 = vpop.f32.mrf.mxu1 }
 0x3d9   :  { %v3886_v25 = vadd.f32 %v3885_v17, %v3810_v51 }
 0x3da   :  { %v3959_v31 = vpop.f32.mrf.mxu0  ;;  %v4337_v63 = vpop.f32.mrf.mxu1 }
 0x3db   :  { %v3960_v35 = vadd.f32 %v3959_v31, %v3886_v25  ;;  %v4636_v31 = vrot.slane %v7757_v0, 6 }
 0x3dc   :  { %v6754_v29 = vpop.f32.mrf.mxu0  ;;  %v6779_v45 = vpop.f32.mrf.mxu1 }
 0x3dd   :  { %v4034_v59 = vadd.f32 %v4033_v14, %v3960_v35  ;;  %v5697_v14 = vand.u32 4294901760, %v8028_v27 }
 0x3de   :  { %v4107_v30 = vpop.f32.mrf.mxu0  ;;  %v4485_v4 = vpop.f32.mrf.mxu1 }
 0x3df   :  { %v4108_v5 = vadd.f32 %v4107_v30, %v4034_v59 }
 0x3e0   :  { %v6764_v9 = vpop.f32.mrf.mxu0  ;;  %v6789_v11 = vpop.f32.mrf.mxu1 }
 0x3e1   :  { %v4180_v15 = vadd.f32 %v4179_v39, %v4108_v5  ;;  %v5698_v39 = vsub.f32 %v8028_v27, %v5697_v14 }
 0x3e2   :  { %v4261_v55 = vpop.f32.mrf.mxu0  ;;  %v4631_v42 = vpop.f32.mrf.mxu1 }
 0x3e3   :  { %4183 = vst.msk [vmem:[#allocation3 + $0x4] sm:$0x3] %vm1928_vm3, %v4180_v15  ;;  %v4639_v21 = vsel %vm1478_vm5, %v4180_v15, 0  ;;  %v4262_v60 = vadd.f32 %v4261_v55, %v4184_v34  ;;  %v5699_v18 = vand.u32 4294901760, %v5698_v39 }
 0x3e4   :  { %v4707_v28 = vand.u32 4294901760, %v4639_v21  ;;  %v6774_v46 = vpop.f32.mrf.mxu0  ;;  %v6799_v19 = vpop.f32.mrf.mxu1 }
 0x3e5   :  { %v4338_v12 = vadd.f32 %v4337_v63, %v4262_v60 }
 0x3e6   :  { %v4708_v49 = vsub.f32 %v4639_v21, %v4707_v28  ;;  %v4411_v53 = vpop.f32.mrf.mxu0  ;;  %6808 = vmatmul.mubr.f32.vlgmr.msra.gmra.mxu1 %v4707_v28 }
 0x3e7   :  { %v4412_v62 = vadd.f32 %v4411_v53, %v4338_v12  ;;  %6816 = vmatpush3.msra.mxu1 %v7749_v32  ;;  %6817 = vmatprep.mubr.msk.f32.mxu1 %vm6873_vm2, %v6872_v1 }
 0x3e8   :  { %v6784_v10 = vpop.f32.mrf.mxu0  ;;  %v4709_v50 = vand.u32 4294901760, %v4708_v49  ;;  %6825 = vmatprep.subr.mxu1 %v6872_v1 }
 0x3e9   :  { %v4486_v57 = vadd.f32 %v4485_v4, %v4412_v62 }
 0x3ea   :  { %v4559_v37 = vpop.f32.mrf.mxu0  ;;  %6818 = vmatmul.mubr.f32.vlgmr.msra.gmra.mxu1 %v4709_v50  ;;  %v4710_v13 = vsub.f32 %v4708_v49, %v4709_v50 }
 0x3eb   :  { %v4560_v56 = vadd.f32 %v4559_v37, %v4486_v57  ;;  %6826 = vmatpush3.msra.mxu1 %v7749_v32  ;;  %6827 = vmatprep.mubr.msk.f32.mxu1 %vm6873_vm2, %v6872_v1 }
 0x3ec   :  { %v6794_v2 = vpop.f32.mrf.mxu0  ;;  %v4711_v61 = vand.u32 4294901760, %v4710_v13  ;;  %6835 = vmatprep.subr.mxu1 %v6872_v1 }
 0x3ed   :  { %v4632_v33 = vadd.f32 %v4631_v42, %v4560_v56 }
 0x3ee   :  { %6803 = vmatmul.mubr.f32.vlgmr.msra.gmra.mxu0 %v4711_v61  ;;  %6828 = vmatmul.mubr.f32.vlgmr.msra.gmra.mxu1 %v4707_v28 }
 0x3ef   :  { %4635 = vst.msk [vmem:[#allocation2 + $0x6] sm:$0x3] %vm1928_vm3, %v4632_v33  ;;  %6811 = vmatpush3.msra.mxu0 %v7755_v3  ;;  %6812 = vmatprep.mubr.msk.f32.mxu0 %vm6873_vm2, %v6872_v1 }
 0x3f0   :  { %6820 = vmatprep.subr.mxu0 %v6872_v1  ;;  %6836 = vmatpush3.msra.mxu1 %v7785_v6 }
 0x3f1   :  { %6837 = vmatprep.mubr.msk.f32.mxu1 %vm6873_vm2, %v6872_v1  ;;  %6845 = vmatprep.subr.mxu1 %v6872_v1 }
 0x3f2   :  { %6813 = vmatmul.mubr.f32.vlgmr.msra.gmra.mxu0 %v4708_v49 }
 0x3f3   :  { %6821 = vmatpush3.msra.mxu0 %v7762_v8  ;;  %6822 = vmatprep.mubr.msk.f32.mxu0 %vm6873_vm2, %v6872_v1 }
 0x3f4   :  { %6830 = vmatprep.subr.mxu0 %v6872_v1 }
 0x3f6   :  { %6823 = vmatmul.mubr.f32.vlgmr.msra.gmra.mxu0 %v4707_v28  ;;  %v5088_v6 = vld [vmem:[#allocation2] sm:$0xff] }
 0x3f7   :  { %v5090_v43 = vsel %vm1478_vm5, %v5088_v6, 0  ;;  %6831 = vmatpush3.msra.mxu0 %v7749_v32  ;;  %6832 = vmatprep.mubr.msk.f32.mxu0 %vm6873_vm2, %v6872_v1 }
 0x3f8   :  { %v5158_v17 = vand.u32 4294901760, %v5090_v43  ;;  %6840 = vmatprep.subr.mxu0 %v6872_v1 }
 0x3fa   :  { %v5159_v23 = vsub.f32 %v5090_v43, %v5158_v17  ;;  %6838 = vmatmul.mubr.f32.vlgmr.msra.gmra.mxu1 %v5158_v17 }
 0x3fb   :  { %6846 = vmatpush3.msra.mxu1 %v7749_v32  ;;  %6847 = vmatprep.mubr.msk.f32.mxu1 %vm6873_vm2, %v6872_v1 }
 0x3fc   :  { %v5160_v44 = vand.u32 4294901760, %v5159_v23  ;;  %6855 = vmatprep.subr.mxu1 %v6872_v1 }
 0x3fe   :  { %6848 = vmatmul.mubr.f32.vlgmr.msra.gmra.mxu1 %v5160_v44  ;;  %v5161_v51 = vsub.f32 %v5159_v23, %v5160_v44 }
 0x3ff   :  { %6856 = vmatpush3.msra.mxu1 %v7749_v32  ;;  %6857 = vmatprep.mubr.msk.f32.mxu1 %vm6873_vm2, %v6872_v1 }
 0x400   :  { %v5162_v7 = vand.u32 4294901760, %v5161_v51  ;;  %5694 = vmatprep.subr.mxu1 %v5693_v24 }
 0x402   :  { %6833 = vmatmul.mubr.f32.vlgmr.msra.gmra.mxu0 %v5162_v7  ;;  %6858 = vmatmul.mubr.f32.vlgmr.msra.gmra.mxu1 %v5158_v17 }
 0x403   :  { %6841 = vmatpush3.msra.mxu0 %v7755_v3  ;;  %6842 = vmatprep.mubr.msk.f32.mxu0 %vm6873_vm2, %v6872_v1 }
 0x404   :  { %5700 = vmatpush1.msra.mxu1 %v5699_v18  ;;  %5733 = vmatprep.mubr.f32.mxu1 %v6872_v1 }
 0x405   :  { %6850 = vmatprep.subr.mxu0 %v6872_v1  ;;  %5879 = vmatprep.subr.mxu1 %v5589_v47 }
 0x406   :  { %6843 = vmatmul.mubr.f32.vlgmr.msra.gmra.mxu0 %v5159_v23  ;;  %5735 = vmatmul.mubr.f32.vlgmr.msra.gmra.mxu1 %v7771_v16 }
 0x407   :  { %6851 = vmatpush3.msra.mxu0 %v7762_v8  ;;  %6852 = vmatprep.mubr.msk.f32.mxu0 %vm6873_vm2, %v6872_v1 }
 0x408   :  { %5590 = vmatprep.subr.mxu0 %v5589_v47  ;;  %5740 = vmatprep.mubr.f32.mxu1 %v6872_v1 }
 0x409   :  { %5881 = vmatpush1.msra.mxu1 %v8018_v20 }
 0x40a   :  { %6853 = vmatmul.mubr.f32.vlgmr.msra.gmra.mxu0 %v5158_v17  ;;  %6065 = vmatprep.subr.mxu1 %v5589_v47 }
 0x40b   :  { %5592 = vmatpush1.msra.mxu0 %v8018_v20  ;;  %5625 = vmatprep.mubr.f32.mxu0 %v6872_v1 }
 0x40c   :  { %5787 = vmatprep.subr.mxu0 %v5690_v41 }
 0x40e   :  { %5631 = vmatmul.mubr.f32.vlgmr.msra.gmra.mxu0 %v7825_v38 }
 0x40f   :  { %5790 = vmatpush1.msra.mxu0 %v8028_v27  ;;  %5636 = vmatprep.mubr.f32.mxu0 %v6872_v1  ;;  %v5544_v27 = vlaneseq }
 0x410   :  { %5975 = vmatprep.subr.mxu0 %v5691_v58 }
 0x4a6   :  { %v4789_v32 = vpop.f32.mrf.mxu1 }
 0x4a8   :  { %v6809_v3 = vpop.f32.mrf.mxu1 }
 0x4aa   :  { %v4937_v8 = vpop.f32.mrf.mxu1 }
 0x4ac   :  { %v6819_v25 = vpop.f32.mrf.mxu1 }
 0x4ae   :  { %v4713_v63 = vpop.f32.mrf.mxu0  ;;  %v5083_v35 = vpop.f32.mrf.mxu1 }
 0x4af   :  { %v4714_v29 = vadd.f32 %v4713_v63, %v4636_v31  ;;  %v81_v63 = vld [vmem:[%s8127_s5] sm:$0x3] }
 0x4b0   :  { %v6804_v45 = vpop.f32.mrf.mxu0  ;;  %v6829_v59 = vpop.f32.mrf.mxu1 }
 0x4b1   :  { %v4790_v30 = vadd.f32 %v4789_v32, %v4714_v29  ;;  %v5545_v32 = vshrl.u32 %v5544_v27, 7 }
 0x4b2   :  { %v4863_v4 = vpop.f32.mrf.mxu0 }
 0x4b3   :  { %v4864_v5 = vadd.f32 %v4863_v4, %v4790_v30  ;;  %v5546_v31 = vsub.s32 0, %v5545_v32  ;;  %v5550_v29 = vsub.s32 1, %v5545_v32 }
 0x4b4   :  { %v6814_v38 = vpop.f32.mrf.mxu0 }
 0x4b5   :  { %v4938_v9 = vadd.f32 %v4937_v8, %v4864_v5  ;;  %v5547_v30 = vrot.slane %v81_v63, %v5546_v31  ;;  %v5551_v38 = vrot.slane %v81_v63, %v5550_v29  ;;  %v6870_v63 = vld [vmem:[%s8117_s0 + $0x10] sm:$0x3] }
 0x4b6   :  { %v5011_v11 = vpop.f32.mrf.mxu0 }
 0x4b7   :  { %v5012_v15 = vadd.f32 %v5011_v11, %v4938_v9 }
 0x4b8   :  { %v6824_v34 = vpop.f32.mrf.mxu0 }
 0x4b9   :  { %v5084_v55 = vadd.f32 %v5083_v35, %v5012_v15 }
 0x4ba   :  { %v5240_v42 = vpop.f32.mrf.mxu1 }
 0x4bb   :  { %5087 = vst.msk [vmem:[#allocation3 + $0x6] sm:$0x3] %vm1928_vm3, %v5084_v55 }
 0x4bc   :  { %v6839_v21 = vpop.f32.mrf.mxu1 }
 0x4be   :  { %v5388_v60 = vpop.f32.mrf.mxu1 }
 0x4c0   :  { %v6849_v28 = vpop.f32.mrf.mxu1 }
 0x4c2   :  { %v5164_v46 = vpop.f32.mrf.mxu0  ;;  %v5534_v19 = vpop.f32.mrf.mxu1  ;;  %v6175_v12 = vld [vmem:[#allocation3] sm:$0xff] }
 0x4c3   :  { %v5165_v49 = vadd.f32 %v5164_v46, %v7757_v0  ;;  %v6181_v53 = vsub.f32 %v6175_v12, %v7752_v40 }
 0x4c4   :  { %v6834_v62 = vpop.f32.mrf.mxu0  ;;  %v6859_v10 = vpop.f32.mrf.mxu1 }
 0x4c5   :  { %v5241_v50 = vadd.f32 %v5240_v42, %v5165_v49  ;;  %v6182_v57 = vmul.f32 %v6181_v53, %v6181_v53 }
 0x4c6   :  { %v5314_v26 = vpop.f32.mrf.mxu0 }
 0x4c7   :  { %v5315_v37 = vadd.f32 %v5314_v26, %v5241_v50  ;;  %v6183_v13 = vsel %vm1478_vm5, %v6182_v57, 0.0 }
 0x4c8   :  { %6184 = vadd.xlane.f32.xlu1 %v6183_v13  ;;  %v6844_v56 = vpop.f32.mrf.mxu0 }
 0x4c9   :  { %v5389_v2 = vadd.f32 %v5388_v60, %v5315_v37 }
 0x4ca   :  { %v5462_v61 = vpop.f32.mrf.mxu0 }
 0x4cb   :  { %v5463_v47 = vadd.f32 %v5462_v61, %v5389_v2 }
 0x4cc   :  { %v6854_v33 = vpop.f32.mrf.mxu0 }
 0x4cd   :  { %v5535_v36 = vadd.f32 %v5534_v19, %v5463_v47 }
 0x4cf   :  { %v5539_v41 = vrot.slane %v5535_v36, 6 }
 0x4d1   :  { %v5542_v40 = vsel %vm5541_vm6, %v7743_v54, %v5539_v41  ;;  %v5557_v0 = vsel %vm1478_vm5, %v5539_v41, 0 }
 0x4d2   :  { %v5648_v58 = vand.u32 4294901760, %v5557_v0  ;;  %v5555_v6 = vsel %vm1478_vm5, %v5542_v40, 0 }
 0x4d3   :  { %v5637_v43 = vand.u32 4294901760, %v5555_v6 }
 0x4d4   :  { %v5649_v17 = vsub.f32 %v5557_v0, %v5648_v58 }
 0x4d5   :  { %5742 = vmatmul.mubr.f32.gmra.mxu1 %v5637_v43  ;;  %v5638_v22 = vsub.f32 %v5555_v6, %v5637_v43 }
 0x4d6   :  { %5747 = vmatprep.mubr.f32.mxu1 %v6872_v1  ;;  %v5650_v44 = vand.u32 4294901760, %v5649_v17 }
 0x4d7   :  { %v5639_v23 = vand.u32 4294901760, %v5638_v22 }
 0x4d8   :  { %v5651_v51 = vsub.f32 %v5649_v17, %v5650_v44 }
 0x4d9   :  { %5749 = vmatmul.mubr.f32.gmra.mxu1 %v5648_v58  ;;  %v5640_v24 = vsub.f32 %v5638_v22, %v5639_v23 }
 0x4da   :  { %5914 = vmatprep.mubr.f32.mxu1 %v6872_v1  ;;  %v5652_v54 = vand.u32 4294901760, %v5651_v51 }
 0x4db   :  { %v5641_v39 = vand.u32 4294901760, %v5640_v24 }
 0x4dd   :  { %5642 = vmatmul.mubr.f32.gmra.mxu0 %v5641_v39  ;;  %5918 = vmatmul.mubr.f32.vlgmr.msra.gmra.mxu1 %v7797_v52 }
 0x4de   :  { %5647 = vmatprep.mubr.f32.mxu0 %v6872_v1  ;;  %5923 = vmatprep.mubr.f32.mxu1 %v6872_v1 }
 0x4df   :  { %6067 = vmatpush1.msra.mxu1 %v8018_v20 }
 0x4e1   :  { %5653 = vmatmul.mubr.f32.gmra.mxu0 %v5652_v54  ;;  %5927 = vmatmul.mubr.f32.gmra.mxu1 %v5639_v23 }
 0x4e2   :  { %5823 = vmatprep.mubr.f32.mxu0 %v6872_v1  ;;  %5932 = vmatprep.mubr.f32.mxu1 %v6872_v1 }
 0x4e5   :  { %5826 = vmatmul.mubr.f32.vlgmr.msra.gmra.mxu0 %v7782_v48  ;;  %5936 = vmatmul.mubr.f32.gmra.mxu1 %v5650_v44  ;;  %v5736_v48 = vpop.f32.mrf.mxu1 }
 0x4e6   :  { %5979 = vmatpush1.msra.mxu0 %v5697_v14  ;;  %5831 = vmatprep.mubr.f32.mxu0 %v6872_v1  ;;  %v5632_v14 = vpop.f32.mrf.mxu0 }
 0x4e7   :  { %6100 = vmatprep.mubr.f32.mxu1 %v6872_v1  ;;  %v5738_v52 = vpop.f32.mrf.mxu1  ;;  %v5633_v15 = vadd.f32 %v5632_v14, %v5547_v30 }
 0x4e8   :  { %v5634_v3 = vpop.f32.mrf.mxu0 }
 0x4e9   :  { %5834 = vmatmul.mubr.f32.gmra.mxu0 %v5638_v22  ;;  %6102 = vmatmul.mubr.f32.vlgmr.msra.gmra.mxu1 %v7771_v16  ;;  %v5635_v42 = vadd.f32 %v5634_v3, %v5551_v38  ;;  %v5737_v46 = vadd.f32 %v5736_v48, %v5633_v15 }
 0x4ea   :  { %5839 = vmatprep.mubr.f32.mxu0 %v6872_v1  ;;  %6107 = vmatprep.mubr.f32.mxu1 %v6872_v1 }
 0x4eb   :  { %v5739_v53 = vadd.f32 %v5738_v52, %v5635_v42  ;;  %v6868_v52 = vld [vmem:[%s8117_s0] sm:$0xff] }
 0x4ed   :  { %5842 = vmatmul.mubr.f32.gmra.mxu0 %v5649_v17  ;;  %6109 = vmatmul.mubr.f32.gmra.mxu1 %v5637_v43 }
 0x4ee   :  { %6012 = vmatprep.mubr.f32.mxu0 %v6872_v1  ;;  %6114 = vmatprep.mubr.f32.mxu1 %v6872_v1 }
 0x4f1   :  { %6014 = vmatmul.mubr.f32.vlgmr.msra.gmra.mxu0 %v7771_v16  ;;  %6116 = vmatmul.mubr.f32.gmra.mxu1 %v5648_v58 }
 0x4f2   :  { %6019 = vmatprep.mubr.f32.mxu0 %v6872_v1 }
 0x4f5   :  { %6021 = vmatmul.mubr.f32.gmra.mxu0 %v5637_v43 }
 0x4f6   :  { %6026 = vmatprep.mubr.f32.mxu0 %v6872_v1 }
 0x4f9   :  { %6028 = vmatmul.mubr.f32.gmra.mxu0 %v5648_v58 }
 0x595   :  { %v5743_v20 = vpop.f32.mrf.mxu1 }
 0x597   :  { %v5745_v7 = vpop.f32.mrf.mxu1 }
 0x599   :  { %v5750_v18 = vpop.f32.mrf.mxu1 }
 0x59b   :  { %v5752_v8 = vpop.f32.mrf.mxu1 }
 0x59d   :  { %v5643_v25 = vpop.f32.mrf.mxu0  ;;  %v5919_v16 = vpop.f32.mrf.mxu1 }
 0x59e   :  { %v5644_v28 = vadd.f32 %v5643_v25, %v5547_v30 }
 0x59f   :  { %v5645_v1 = vpop.f32.mrf.mxu0  ;;  %v5921_v35 = vpop.f32.mrf.mxu1 }
 0x5a0   :  { %v5646_v12 = vadd.f32 %v5645_v1, %v5551_v38  ;;  %v5744_v57 = vadd.f32 %v5743_v20, %v5644_v28 }
 0x5a1   :  { %v5654_v45 = vpop.f32.mrf.mxu0  ;;  %v5928_v59 = vpop.f32.mrf.mxu1 }
 0x5a2   :  { %v5655_v26 = vadd.f32 %v5654_v45, %v5547_v30  ;;  %v5746_v2 = vadd.f32 %v5745_v7, %v5646_v12  ;;  %v6869_v7 = vld [vmem:[%s8117_s0 + $0x8] sm:$0xff] }
 0x5a3   :  { %v5656_v4 = vpop.f32.mrf.mxu0  ;;  %v5930_v5 = vpop.f32.mrf.mxu1 }
 0x5a4   :  { %v5657_v13 = vadd.f32 %v5656_v4, %v5551_v38  ;;  %v5751_v0 = vadd.f32 %v5750_v18, %v5655_v26 }
 0x5a5   :  { %v5827_v9 = vpop.f32.mrf.mxu0  ;;  %v5937_v11 = vpop.f32.mrf.mxu1 }
 0x5a6   :  { %v5828_v49 = vadd.f32 %v5827_v9, %v5737_v46  ;;  %v5753_v6 = vadd.f32 %v5752_v8, %v5657_v13  ;;  %v6871_v9 = vld [vmem:[%s8117_s0 + $0x18] sm:$0x3] }
 0x5a7   :  { %v5829_v34 = vpop.f32.mrf.mxu0  ;;  %v5939_v55 = vpop.f32.mrf.mxu1 }
 0x5a8   :  { %v5830_v50 = vadd.f32 %v5829_v34, %v5739_v53  ;;  %v5920_v61 = vadd.f32 %v5919_v16, %v5828_v49 }
 0x5a9   :  { %v5835_v21 = vpop.f32.mrf.mxu0  ;;  %v6103_v60 = vpop.f32.mrf.mxu1 }
 0x5aa   :  { %v5836_v56 = vadd.f32 %v5835_v21, %v5744_v57  ;;  %v5922_v40 = vadd.f32 %v5921_v35, %v5830_v50 }
 0x5ab   :  { %v5837_v19 = vpop.f32.mrf.mxu0  ;;  %v6105_v62 = vpop.f32.mrf.mxu1 }
 0x5ac   :  { %v5838_v36 = vadd.f32 %v5837_v19, %v5746_v2  ;;  %v5929_v22 = vadd.f32 %v5928_v59, %v5836_v56 }
 0x5ad   :  { %v5843_v10 = vpop.f32.mrf.mxu0  ;;  %v6110_v47 = vpop.f32.mrf.mxu1 }
 0x5ae   :  { %v5844_v23 = vadd.f32 %v5843_v10, %v5751_v0  ;;  %v5931_v48 = vadd.f32 %v5930_v5, %v5838_v36 }
 0x5af   :  { %v5845_v37 = vpop.f32.mrf.mxu0  ;;  %v6112_v44 = vpop.f32.mrf.mxu1 }
 0x5b0   :  { %v5846_v39 = vadd.f32 %v5845_v37, %v5753_v6  ;;  %v5938_v25 = vadd.f32 %v5937_v11, %v5844_v23 }
 0x5b1   :  { %v6015_v33 = vpop.f32.mrf.mxu0  ;;  %v6117_v8 = vpop.f32.mrf.mxu1 }
 0x5b2   :  { %v6016_v41 = vadd.f32 %v6015_v33, %v5920_v61  ;;  %v5940_v29 = vadd.f32 %v5939_v55, %v5846_v39  ;;  %v6185_v33 = vpop.xlane.xlu1 %6184 }
 0x5b3   :  { %v6017_v58 = vpop.f32.mrf.mxu0  ;;  %v6119_v15 = vpop.f32.mrf.mxu1  ;;  %v6186_v36 = vrot.slane %v6185_v33, 4 }
 0x5b4   :  { %v6104_v43 = vadd.f32 %v6103_v60, %v6016_v41  ;;  %v6018_v17 = vadd.f32 %v6017_v58, %v5922_v40 }
 0x5b5   :  { %v6022_v24 = vpop.f32.mrf.mxu0  ;;  %v6187_v40 = vadd.f32 %v6186_v36, %v6185_v33 }
 0x5b6   :  { %v6106_v51 = vadd.f32 %v6105_v62, %v6018_v17  ;;  %v6023_v54 = vadd.f32 %v6022_v24, %v5929_v22  ;;  %v6122_v20 = vsub.f32 %v6104_v43, %v6868_v52 }
 0x5b7   :  { %v6024_v14 = vpop.f32.mrf.mxu0  ;;  %v6188_v6 = vrot.slane %v6187_v40, 2 }
 0x5b8   :  { %v6123_v18 = vsub.f32 %v6106_v51, %v6869_v7  ;;  %v6111_v32 = vadd.f32 %v6110_v47, %v6023_v54  ;;  %v6025_v3 = vadd.f32 %v6024_v14, %v5931_v48  ;;  %v6126_v45 = vmul.f32 %v6122_v20, %v6122_v20 }
 0x5b9   :  { %v6029_v16 = vpop.f32.mrf.mxu0  ;;  %v6189_v24 = vadd.f32 %v6188_v6, %v6187_v40 }
 0x5ba   :  { %v6127_v31 = vmul.f32 %v6123_v18, %v6123_v18  ;;  %v6124_v1 = vsub.f32 %v6111_v32, %v6870_v63  ;;  %v6113_v35 = vadd.f32 %v6112_v44, %v6025_v3  ;;  %v6144_v59 = vsub.f32 %v6111_v32, %v6868_v52 }
 0x5bb   :  { %v6030_v30 = vadd.f32 %v6029_v16, %v5938_v25  ;;  %v6031_v4 = vpop.f32.mrf.mxu0  ;;  %v6190_v52 = vrot.slane %v6189_v24, 1  ;;  %v6194_v18 = vand.u32 127, %v5544_v27 }
 0x5bc   :  { %v6145_v5 = vsub.f32 %v6113_v35, %v6869_v7  ;;  %v6032_v38 = vadd.f32 %v6031_v4, %v5940_v29  ;;  %v6125_v11 = vsub.f32 %v6113_v35, %v6871_v9  ;;  %v6128_v42 = vmul.f32 %v6124_v1, %v6124_v1 }
 0x5bd   :  { %v6118_v34 = vadd.f32 %v6117_v8, %v6030_v30  ;;  %v6130_v21 = vadd.f32 %v6127_v31, %v6126_v45  ;;  %v6148_v46 = vmul.f32 %v6144_v59, %v6144_v59  ;;  %v6191_v7 = vadd.f32 %v6190_v52, %v6189_v24 }
 0x5be   :  { %v6120_v60 = vadd.f32 %v6119_v15, %v6032_v38  ;;  %v6129_v28 = vmul.f32 %v6125_v11, %v6125_v11  ;;  %v6131_v55 = vsel %vm5541_vm6, %v6128_v42, 0.0  ;;  %v6149_v12 = vmul.f32 %v6145_v5, %v6145_v5 }
 0x5bf   :  { %v6146_v19 = vsub.f32 %v6118_v34, %v6870_v63  ;;  %v6132_v53 = vadd.f32 %v6131_v55, %v6130_v21  ;;  %v6157_v37 = vrot.slane %v6148_v46, 2  ;;  %vm6197_vm7 = vcmp.eq.s32.totalorder %v6194_v18, 2 }
 0x5c0   :  { %v6147_v49 = vsub.f32 %v6120_v60, %v6871_v9  ;;  %v6133_v62 = vsel %vm5541_vm6, %v6129_v28, 0.0  ;;  %v6160_v13 = vrot.slane %v6149_v12, 2  ;;  %vm6196_vm8 = vcmp.eq.s32.totalorder %v6194_v18, 1 }
 0x5c1   :  { %v6150_v10 = vmul.f32 %v6146_v19, %v6146_v19  ;;  %v6134_v57 = vadd.f32 %v6133_v62, %v6132_v53  ;;  %vm6195_vm9 = vcmp.eq.s32.totalorder %v6194_v18, 0 }
 0x5c2   :  { %v6151_v50 = vmul.f32 %v6147_v49, %v6147_v49 }
 0x5c3   :  { %v6158_v26 = vrot.slane %v6150_v10, 2  ;;  %6135 = vadd.xlane.f32.xlu0 %v6134_v57 }
 0x5c4   :  { %v6161_v56 = vrot.slane %v6151_v50, 2 }
 0x5c5   :  { %v6159_v2 = vsel %vm6156_vm4, %v6157_v37, %v6158_v26 }
 0x5c6   :  { %v6162_v61 = vsel %vm6156_vm4, %v6160_v13, %v6161_v56 }
 0x5c7   :  { %v6165_v47 = vadd.f32 %v6162_v61, %v6159_v2 }
 0x5c9   :  { %6166 = vadd.xlane.f32.xlu0 %v6165_v47 }
 0x64c   :  { %v6136_v41 = vpop.xlane.xlu0 %6135 }
 0x64d   :  { %v6137_v0 = vrot.slane %v6136_v41, 4 }
 0x64f   :  { %v6138_v58 = vadd.f32 %v6137_v0, %v6136_v41 }
 0x651   :  { %v6139_v43 = vrot.slane %v6138_v58, 2 }
 0x652   :  { %v6167_v17 = vpop.xlane.xlu0 %6166 }
 0x653   :  { %v6168_v22 = vrot.slane %v6167_v17, 4  ;;  %v6140_v23 = vadd.f32 %v6139_v43, %v6138_v58 }
 0x655   :  { %v6169_v44 = vadd.f32 %v6168_v22, %v6167_v17  ;;  %v6141_v39 = vrot.slane %v6140_v23, 1 }
 0x657   :  { %v6170_v51 = vrot.slane %v6169_v44, 2  ;;  %v6142_v54 = vadd.f32 %v6141_v39, %v6140_v23 }
 0x659   :  { %v6171_v48 = vadd.f32 %v6170_v51, %v6169_v44  ;;  %6860 = vpush %v6142_v54 }
 0x65b   :  { %v6172_v20 = vrot.slane %v6171_v48, 1 }
 0x65d   :  { %v6173_v14 = vadd.f32 %v6172_v20, %v6171_v48 }
 0x65f   :  { %6862 = vpush %v6173_v14 }
 0x660   :  { %6864 = vpush %v6191_v7 }
 0x68a   :  { %s6861_s0 = spop %6860 }
 0x68b   :  { %v6202_v25 = vstv %s6861_s0 }
 0x690   :  { %s6863_s21 = spop %6862 }
 0x691   :  { %v6200_v32 = vstv %s6863_s21  ;;  %s6865_s22 = spop %6864 }
 0x692   :  { %v6198_v3 = vstv %s6865_s22 }
 0x693   :  { %v6199_v8 = vsel %vm6197_vm7, %v6198_v3, 0.0 }
 0x694   :  { %v6201_v16 = vsel %vm6196_vm8, %v6200_v32, %v6199_v8 }
 0x695   :  { %v6203_v31 = vsel %vm6195_vm9, %v6202_v25, %v6201_v16 }
 0x696   :  { %6204 = vst [vmem:[%s8128_s12] sm:$0x1] %v6203_v31 }

</bundles_post_ra>
